<compile_context>
chip_gen: v5e
topology: v5e:2x2
jax: 0.10.0
libtpu: 0.0.40
codegen_flags: <defaults>
</compile_context>

<pallas_src>
import functools

import jax
import jax.numpy as jnp
from jax import lax
from jax.experimental import pallas as pl
from jax.experimental.pallas import tpu as pltpu

EPS = 1e-5   # nn.InstanceNorm2d default eps (affine=False, biased variance)
K = 3        # kernel size ("size" arg of ResBlock); padding=1 keeps spatial dims


def resblock_kernel(x_ref, w1_ref, w2_ref, o_ref, xs_ref, *, H, W, Nb):
    # x_ref : (Nb, C, H*W)            Nb images, channels-first, spatial flattened
    # w1_ref: (C, 9*C)                conv1 taps: [c_out, (kh*3+kw)*C + c_in]
    # w2_ref: (C, 9*C)                conv2 taps, same packing (bias dropped)
    # o_ref : (Nb, C, H*W)            output block (lane-dense minor dim)
    # xs_ref: (Nb, C, H*W + 2*(W+1))  flat images with zero halos of width W+1
    C = x_ref.shape[1]
    HW = H * W
    M = W + 1                       # halo width (covers flat shifts up to +/-(W+1))
    inv_hw = 1.0 / HW

    # Zero only the tiny halo margins, every step (centre is always rewritten).
    # Per-step (not program_id==0-gated) so "parallel" grid sharding stays correct.
    zero_margin = jnp.zeros((Nb, C, M), jnp.float32)
    xs_ref[:, :, 0:M] = zero_margin
    xs_ref[:, :, M + HW:M + HW + M] = zero_margin

    # Column masks that kill the row wrap-around of the +/-1 horizontal shifts.
    col = lax.broadcasted_iota(jnp.int32, (1, HW), 1) % W
    mask_l = jnp.where(col != 0, 1.0, 0.0)       # dw == -1 (kills column w==0)
    mask_r = jnp.where(col != W - 1, 1.0, 0.0)   # dw == +1 (kills column w==W-1)

    taps = [(kh - 1, kw - 1) for kh in range(3) for kw in range(3)]

    def conv3x3(n, w_ref):
        # 9 per-tap accumulating matmuls; the shifted slabs never round-trip
        # through an im2col VMEM buffer.  (C,C)@(C,HW) per tap -- MXU occupancy
        # is irrelevant at C=4 (review item: don't chase MXU shape here).
        acc = None
        for k, (dh, dw) in enumerate(taps):
            start = M + dh * W + dw                   # static, in [0, 2W+2]
            slab = xs_ref[n, :, start:start + HW]     # (C, HW)
            if dw == -1:
                slab = slab * mask_l
            elif dw == 1:
                slab = slab * mask_r
            part = jnp.dot(w_ref[:, k * C:(k + 1) * C], slab,
                           preferred_element_type=jnp.float32)
            acc = part if acc is None else acc + part
        return acc                                    # (C, HW) f32

    def instance_norm(v):
        # Two-pass (subtract-mean) variance: biased, eps inside rsqrt, no affine.
        mean = jnp.sum(v, axis=1, keepdims=True) * inv_hw
        c = v - mean
        var = jnp.sum(c * c, axis=1, keepdims=True) * inv_hw
        return c * lax.rsqrt(var + EPS)

    for n in range(Nb):                               # static unroll, Nb is small
        x = x_ref[n].astype(jnp.float32)              # (C, HW)

        # conv1 -> InstanceNorm -> ReLU
        xs_ref[n, :, M:M + HW] = x
        y1 = jnp.maximum(instance_norm(conv3x3(n, w1_ref)), 0.0)

        # conv2 -> InstanceNorm  (conv2's bias is mathematically cancelled by
        # the InstanceNorm mean subtraction, so it is never loaded or added)
        xs_ref[n, :, M:M + HW] = y1
        y2 = instance_norm(conv3x3(n, w2_ref))

        # residual add, lane-dense store (minor dim HW = multiple of 128)
        o_ref[n] = (x + y2).astype(o_ref.dtype)


def resblock_forward(x_nchw, w1_hwio, w2_hwio, b2, *, images_per_step=None):
    """ResBlock forward. x_nchw: (N, C, H, W); conv weights HWIO (3, 3, C, C)."""
    del b2   # cancelled exactly by the second InstanceNorm's mean subtraction
    N, C, H, W = x_nchw.shape
    HW = H * W

    # Whole batch per grid step by default: at these sizes the kernel is
    # per-grid-step-overhead bound, so fewer, fatter steps win.
    Nb = N if images_per_step is None else images_per_step
    assert N % Nb == 0, "images_per_step must divide the batch size"

    x2d = x_nchw.reshape(N, C, HW)          # free row-major reshape (no transpose)
    # Pack taps: w_mat[c_out, (kh*3+kw)*C + c_in] = w_hwio[kh, kw, c_in, c_out]
    w1m = w1_hwio.reshape(9 * C, C).T
    w2m = w2_hwio.reshape(9 * C, C).T

    kernel = functools.partial(resblock_kernel, H=H, W=W, Nb=Nb)
    cost = pl.CostEstimate(
        flops=N * 2 * 2 * 9 * C * C * HW,                    # two 3x3 convs (matmul)
        transcendentals=N * 2 * C,                           # rsqrt per channel/norm
        bytes_accessed=4 * (2 * N * C * HW + 2 * 9 * C * C),
    )

    out2d = pl.pallas_call(
        kernel,
        out_shape=jax.ShapeDtypeStruct((N, C, HW), x_nchw.dtype),
        grid_spec=pltpu.PrefetchScalarGridSpec(
            num_scalar_prefetch=0,
            grid=(N // Nb,),
            in_specs=[
                pl.BlockSpec((Nb, C, HW), lambda g: (g, 0, 0)),
                pl.BlockSpec((C, 9 * C), lambda g: (0, 0)),
                pl.BlockSpec((C, 9 * C), lambda g: (0, 0)),
            ],
            out_specs=pl.BlockSpec((Nb, C, HW), lambda g: (g, 0, 0)),
            scratch_shapes=[
                pltpu.VMEM((Nb, C, HW + 2 * (W + 1)), jnp.float32),  # halo-padded
            ],
        ),
        compiler_params=pltpu.CompilerParams(
            dimension_semantics=("parallel",)),
        cost_estimate=cost,
    )(x2d, w1m, w2m)

    return out2d.reshape(N, C, H, W)
    # TODO(synk): on v7x, split the batch across the 2 TensorCores
    # (images_per_step = N // 2 with CORE_PARALLEL / pl.core_map); for large
    # C/H/W, cast matmul operands to bf16 and add a spatial grid axis (1-row
    # halo) to bound VMEM -- the per-tap accumulating-dot structure above
    # already avoids any (9C, HW) im2col scratch.


def resblock_ref(x_nchw, w1_hwio, w2_hwio, b2):
    """Pure-JAX reference matching the PyTorch module semantics (NCHW in/out)."""
    x = jnp.transpose(x_nchw, (0, 2, 3, 1)).astype(jnp.float32)

    def conv(v, w):
        return lax.conv_general_dilated(
            v, w, window_strides=(1, 1), padding=((1, 1), (1, 1)),
            dimension_numbers=("NHWC", "HWIO", "NHWC"),
            precision=lax.Precision.HIGHEST)

    def inorm(v):
        m = jnp.mean(v, axis=(1, 2), keepdims=True)
        va = jnp.mean((v - m) ** 2, axis=(1, 2), keepdims=True)
        return (v - m) * lax.rsqrt(va + EPS)

    y = jax.nn.relu(inorm(conv(x, w1_hwio)))
    y = inorm(conv(y, w2_hwio) + b2)
    out = x + y
    return jnp.transpose(out, (0, 3, 1, 2))


if __name__ == "__main__":
    key = jax.random.PRNGKey(0)
    k1, k2, k3, k4 = jax.random.split(key, 4)
    N, C, H, W = 2, 4, 16, 16   # ResBlock(n=4, size=3)

    x = jax.random.normal(k1, (N, C, H, W), dtype=jnp.float32)
    # deterministic synthetic parameters (HWIO layout)
    w1 = 0.1 * jax.random.normal(k2, (K, K, C, C), dtype=jnp.float32)
    w2 = 0.1 * jax.random.normal(k3, (K, K, C, C), dtype=jnp.float32)
    b2 = 0.1 * jax.random.normal(k4, (C,), dtype=jnp.float32)

    out = jax.block_until_ready(resblock_forward(x, w1, w2, b2))
    ref = jax.block_until_ready(resblock_ref(x, w1, w2, b2))

    assert out.shape == (N, C, H, W)
    max_err = float(jnp.max(jnp.abs(out - ref)))
    assert jnp.allclose(out, ref, atol=1e-4, rtol=1e-4), f"max_err={max_err}"
    print("KERNEL_OK")
</pallas_src>

<mosaic_0001>
module attributes {stable_mosaic.version = 11 : i64} {
  func.func @resblock_kernel(%arg0: i32, %arg1: memref<2x4x256xf32, #tpu.memory_space<vmem>>, %arg2: memref<4x36xf32, #tpu.memory_space<vmem>>, %arg3: memref<4x36xf32, #tpu.memory_space<vmem>>, %arg4: memref<2x4x256xf32, #tpu.memory_space<vmem>>, %arg5: memref<2x4x290xf32, #tpu.memory_space<vmem>>) attributes {dimension_semantics = [#tpu.dimension_semantics<parallel>], iteration_bounds = array<i64: 1>, scalar_prefetch = 0 : i64, scratch_operands = 1 : i64, tpu.core_type = #tpu.core_type<tc>, window_params = [{transform_indices = @transform_0, window_bounds = array<i64: 2, 4, 256>}, {pipeline_mode = #tpu.pipeline_mode<synchronous>, transform_indices = @transform_1, window_bounds = array<i64: 4, 36>}, {pipeline_mode = #tpu.pipeline_mode<synchronous>, transform_indices = @transform_2, window_bounds = array<i64: 4, 36>}, {transform_indices = @transform_3, window_bounds = array<i64: 2, 4, 256>}]} {
    %cst = arith.constant 0.000000e+00 : f32
    %0 = vector.broadcast %cst : f32 to vector<2x4x17xf32>
    %c0 = arith.constant 0 : index
    %c0_0 = arith.constant 0 : index
    %c0_1 = arith.constant 0 : index
    %1 = vector.load %arg5[%c0, %c0_0, %c0_1] : memref<2x4x290xf32, #tpu.memory_space<vmem>>, vector<2x4x17xf32>
    tpu.vector_store %arg5[%c0, %c0_0, %c0_1], %0 {strides = array<i32>} : memref<2x4x290xf32, #tpu.memory_space<vmem>>, vector<2x4x17xf32>,
    %c0_2 = arith.constant 0 : index
    %c0_3 = arith.constant 0 : index
    %c273 = arith.constant 273 : index
    %2 = vector.load %arg5[%c0_2, %c0_3, %c273] : memref<2x4x290xf32, #tpu.memory_space<vmem>>, vector<2x4x17xf32>
    tpu.vector_store %arg5[%c0_2, %c0_3, %c273], %0 {strides = array<i32>} : memref<2x4x290xf32, #tpu.memory_space<vmem>>, vector<2x4x17xf32>,
    %3 = tpu.iota {dimensions = array<i32: 1>} : vector<1x256xi32>
    %c16_i32 = arith.constant 16 : i32
    %c0_i32 = arith.constant 0 : i32
    %4 = arith.cmpi eq, %c16_i32, %c0_i32 : i32
    %c1_i32 = arith.constant 1 : i32
    %5 = arith.select %4, %c1_i32, %c16_i32 : i32
    %6 = vector.broadcast %5 : i32 to vector<1x256xi32>
    %7 = arith.remsi %3, %6 : vector<1x256xi32>
    %c0_i32_4 = arith.constant 0 : i32
    %8 = vector.broadcast %c0_i32_4 : i32 to vector<1x256xi32>
    %9 = arith.cmpi ne, %7, %8 : vector<1x256xi32>
    %c0_i32_5 = arith.constant 0 : i32
    %10 = vector.broadcast %c0_i32_5 : i32 to vector<1x256xi32>
    %11 = arith.cmpi slt, %7, %10 : vector<1x256xi32>
    %c0_i32_6 = arith.constant 0 : i32
    %12 = arith.cmpi slt, %5, %c0_i32_6 : i32
    %13 = vector.broadcast %12 : i1 to vector<1x256xi1>
    %14 = vector.broadcast %13 : vector<1x256xi1> to vector<1x256xi1>
    %15 = arith.xori %11, %14 : vector<1x256xi1>
    %16 = arith.andi %15, %9 : vector<1x256xi1>
    %17 = vector.broadcast %5 : i32 to vector<1x256xi32>
    %18 = arith.addi %7, %17 : vector<1x256xi32>
    %19 = arith.select %16, %18, %7 : vector<1x256xi1>, vector<1x256xi32>
    %c0_i32_7 = arith.constant 0 : i32
    %20 = vector.broadcast %c0_i32_7 : i32 to vector<1x256xi32>
    %21 = arith.cmpi ne, %19, %20 : vector<1x256xi32>
    %cst_8 = arith.constant 1.000000e+00 : f32
    %cst_9 = arith.constant 0.000000e+00 : f32
    %22 = vector.broadcast %cst_8 : f32 to vector<1x256xf32>
    %23 = vector.broadcast %cst_9 : f32 to vector<1x256xf32>
    %24 = arith.select %21, %22, %23 : vector<1x256xi1>, vector<1x256xf32>
    %c15_i32 = arith.constant 15 : i32
    %25 = vector.broadcast %c15_i32 : i32 to vector<1x256xi32>
    %26 = arith.cmpi ne, %19, %25 : vector<1x256xi32>
    %cst_10 = arith.constant 1.000000e+00 : f32
    %cst_11 = arith.constant 0.000000e+00 : f32
    %27 = vector.broadcast %cst_10 : f32 to vector<1x256xf32>
    %28 = vector.broadcast %cst_11 : f32 to vector<1x256xf32>
    %29 = arith.select %26, %27, %28 : vector<1x256xi1>, vector<1x256xf32>
    %c0_12 = arith.constant 0 : index
    %c0_13 = arith.constant 0 : index
    %c0_14 = arith.constant 0 : index
    %30 = vector.load %arg1[%c0_12, %c0_13, %c0_14] : memref<2x4x256xf32, #tpu.memory_space<vmem>>, vector<1x4x256xf32>
    %31 = vector.shape_cast %30 : vector<1x4x256xf32> to vector<4x256xf32>
    %c0_15 = arith.constant 0 : index
    %c0_16 = arith.constant 0 : index
    %c17 = arith.constant 17 : index
    %32 = vector.load %arg5[%c0_15, %c0_16, %c17] : memref<2x4x290xf32, #tpu.memory_space<vmem>>, vector<1x4x256xf32>
    %33 = vector.shape_cast %32 : vector<1x4x256xf32> to vector<4x256xf32>
    %34 = vector.shape_cast %31 : vector<4x256xf32> to vector<1x4x256xf32>
    tpu.vector_store %arg5[%c0_15, %c0_16, %c17], %34 {strides = array<i32>} : memref<2x4x290xf32, #tpu.memory_space<vmem>>, vector<1x4x256xf32>,
    %c0_17 = arith.constant 0 : index
    %c0_18 = arith.constant 0 : index
    %c0_19 = arith.constant 0 : index
    %35 = vector.load %arg5[%c0_17, %c0_18, %c0_19] : memref<2x4x290xf32, #tpu.memory_space<vmem>>, vector<1x4x256xf32>
    %36 = vector.shape_cast %35 : vector<1x4x256xf32> to vector<4x256xf32>
    %37 = vector.broadcast %24 : vector<1x256xf32> to vector<4x256xf32>
    %38 = arith.mulf %36, %37 : vector<4x256xf32>
    %c0_20 = arith.constant 0 : index
    %c0_21 = arith.constant 0 : index
    %39 = vector.load %arg2[%c0_20, %c0_21] : memref<4x36xf32, #tpu.memory_space<vmem>>, vector<4x4xf32>
    %cst_22 = arith.constant dense<0.000000e+00> : vector<4x256xf32>
    %40 = tpu.matmul %39, %38, %cst_22 {dimension_numbers = #tpu.dot_dimension_numbers<[1], [0], [0], [1], [0, 0, 1, 1], [], []>} : vector<4x4xf32>, vector<4x256xf32>, vector<4x256xf32> -> vector<4x256xf32>
    %c0_23 = arith.constant 0 : index
    %c0_24 = arith.constant 0 : index
    %c1 = arith.constant 1 : index
    %41 = vector.load %arg5[%c0_23, %c0_24, %c1] : memref<2x4x290xf32, #tpu.memory_space<vmem>>, vector<1x4x256xf32>
    %42 = vector.shape_cast %41 : vector<1x4x256xf32> to vector<4x256xf32>
    %c0_25 = arith.constant 0 : index
    %c4 = arith.constant 4 : index
    %43 = vector.load %arg2[%c0_25, %c4] : memref<4x36xf32, #tpu.memory_space<vmem>>, vector<4x4xf32>
    %cst_26 = arith.constant dense<0.000000e+00> : vector<4x256xf32>
    %44 = tpu.matmul %43, %42, %cst_26 {dimension_numbers = #tpu.dot_dimension_numbers<[1], [0], [0], [1], [0, 0, 1, 1], [], []>} : vector<4x4xf32>, vector<4x256xf32>, vector<4x256xf32> -> vector<4x256xf32>
    %45 = arith.addf %40, %44 : vector<4x256xf32>
    %c0_27 = arith.constant 0 : index
    %c0_28 = arith.constant 0 : index
    %c2 = arith.constant 2 : index
    %46 = vector.load %arg5[%c0_27, %c0_28, %c2] : memref<2x4x290xf32, #tpu.memory_space<vmem>>, vector<1x4x256xf32>
    %47 = vector.shape_cast %46 : vector<1x4x256xf32> to vector<4x256xf32>
    %48 = vector.broadcast %29 : vector<1x256xf32> to vector<4x256xf32>
    %49 = arith.mulf %47, %48 : vector<4x256xf32>
    %c0_29 = arith.constant 0 : index
    %c8 = arith.constant 8 : index
    %50 = vector.load %arg2[%c0_29, %c8] : memref<4x36xf32, #tpu.memory_space<vmem>>, vector<4x4xf32>
    %cst_30 = arith.constant dense<0.000000e+00> : vector<4x256xf32>
    %51 = tpu.matmul %50, %49, %cst_30 {dimension_numbers = #tpu.dot_dimension_numbers<[1], [0], [0], [1], [0, 0, 1, 1], [], []>} : vector<4x4xf32>, vector<4x256xf32>, vector<4x256xf32> -> vector<4x256xf32>
    %52 = arith.addf %45, %51 : vector<4x256xf32>
    %c0_31 = arith.constant 0 : index
    %c0_32 = arith.constant 0 : index
    %c16 = arith.constant 16 : index
    %53 = vector.load %arg5[%c0_31, %c0_32, %c16] : memref<2x4x290xf32, #tpu.memory_space<vmem>>, vector<1x4x256xf32>
    %54 = vector.shape_cast %53 : vector<1x4x256xf32> to vector<4x256xf32>
    %55 = vector.broadcast %24 : vector<1x256xf32> to vector<4x256xf32>
    %56 = arith.mulf %54, %55 : vector<4x256xf32>
    %c0_33 = arith.constant 0 : index
    %c12 = arith.constant 12 : index
    %57 = vector.load %arg2[%c0_33, %c12] : memref<4x36xf32, #tpu.memory_space<vmem>>, vector<4x4xf32>
    %cst_34 = arith.constant dense<0.000000e+00> : vector<4x256xf32>
    %58 = tpu.matmul %57, %56, %cst_34 {dimension_numbers = #tpu.dot_dimension_numbers<[1], [0], [0], [1], [0, 0, 1, 1], [], []>} : vector<4x4xf32>, vector<4x256xf32>, vector<4x256xf32> -> vector<4x256xf32>
    %59 = arith.addf %52, %58 : vector<4x256xf32>
    %c0_35 = arith.constant 0 : index
    %c0_36 = arith.constant 0 : index
    %c17_37 = arith.constant 17 : index
    %60 = vector.load %arg5[%c0_35, %c0_36, %c17_37] : memref<2x4x290xf32, #tpu.memory_space<vmem>>, vector<1x4x256xf32>
    %61 = vector.shape_cast %60 : vector<1x4x256xf32> to vector<4x256xf32>
    %c0_38 = arith.constant 0 : index
    %c16_39 = arith.constant 16 : index
    %62 = vector.load %arg2[%c0_38, %c16_39] : memref<4x36xf32, #tpu.memory_space<vmem>>, vector<4x4xf32>
    %cst_40 = arith.constant dense<0.000000e+00> : vector<4x256xf32>
    %63 = tpu.matmul %62, %61, %cst_40 {dimension_numbers = #tpu.dot_dimension_numbers<[1], [0], [0], [1], [0, 0, 1, 1], [], []>} : vector<4x4xf32>, vector<4x256xf32>, vector<4x256xf32> -> vector<4x256xf32>
    %64 = arith.addf %59, %63 : vector<4x256xf32>
    %c0_41 = arith.constant 0 : index
    %c0_42 = arith.constant 0 : index
    %c18 = arith.constant 18 : index
    %65 = vector.load %arg5[%c0_41, %c0_42, %c18] : memref<2x4x290xf32, #tpu.memory_space<vmem>>, vector<1x4x256xf32>
    %66 = vector.shape_cast %65 : vector<1x4x256xf32> to vector<4x256xf32>
    %67 = vector.broadcast %29 : vector<1x256xf32> to vector<4x256xf32>
    %68 = arith.mulf %66, %67 : vector<4x256xf32>
    %c0_43 = arith.constant 0 : index
    %c20 = arith.constant 20 : index
    %69 = vector.load %arg2[%c0_43, %c20] : memref<4x36xf32, #tpu.memory_space<vmem>>, vector<4x4xf32>
    %cst_44 = arith.constant dense<0.000000e+00> : vector<4x256xf32>
    %70 = tpu.matmul %69, %68, %cst_44 {dimension_numbers = #tpu.dot_dimension_numbers<[1], [0], [0], [1], [0, 0, 1, 1], [], []>} : vector<4x4xf32>, vector<4x256xf32>, vector<4x256xf32> -> vector<4x256xf32>
    %71 = arith.addf %64, %70 : vector<4x256xf32>
    %c0_45 = arith.constant 0 : index
    %c0_46 = arith.constant 0 : index
    %c32 = arith.constant 32 : index
    %72 = vector.load %arg5[%c0_45, %c0_46, %c32] : memref<2x4x290xf32, #tpu.memory_space<vmem>>, vector<1x4x256xf32>
    %73 = vector.shape_cast %72 : vector<1x4x256xf32> to vector<4x256xf32>
    %74 = vector.broadcast %24 : vector<1x256xf32> to vector<4x256xf32>
    %75 = arith.mulf %73, %74 : vector<4x256xf32>
    %c0_47 = arith.constant 0 : index
    %c24 = arith.constant 24 : index
    %76 = vector.load %arg2[%c0_47, %c24] : memref<4x36xf32, #tpu.memory_space<vmem>>, vector<4x4xf32>
    %cst_48 = arith.constant dense<0.000000e+00> : vector<4x256xf32>
    %77 = tpu.matmul %76, %75, %cst_48 {dimension_numbers = #tpu.dot_dimension_numbers<[1], [0], [0], [1], [0, 0, 1, 1], [], []>} : vector<4x4xf32>, vector<4x256xf32>, vector<4x256xf32> -> vector<4x256xf32>
    %78 = arith.addf %71, %77 : vector<4x256xf32>
    %c0_49 = arith.constant 0 : index
    %c0_50 = arith.constant 0 : index
    %c33 = arith.constant 33 : index
    %79 = vector.load %arg5[%c0_49, %c0_50, %c33] : memref<2x4x290xf32, #tpu.memory_space<vmem>>, vector<1x4x256xf32>
    %80 = vector.shape_cast %79 : vector<1x4x256xf32> to vector<4x256xf32>
    %c0_51 = arith.constant 0 : index
    %c28 = arith.constant 28 : index
    %81 = vector.load %arg2[%c0_51, %c28] : memref<4x36xf32, #tpu.memory_space<vmem>>, vector<4x4xf32>
    %cst_52 = arith.constant dense<0.000000e+00> : vector<4x256xf32>
    %82 = tpu.matmul %81, %80, %cst_52 {dimension_numbers = #tpu.dot_dimension_numbers<[1], [0], [0], [1], [0, 0, 1, 1], [], []>} : vector<4x4xf32>, vector<4x256xf32>, vector<4x256xf32> -> vector<4x256xf32>
    %83 = arith.addf %78, %82 : vector<4x256xf32>
    %c0_53 = arith.constant 0 : index
    %c0_54 = arith.constant 0 : index
    %c34 = arith.constant 34 : index
    %84 = vector.load %arg5[%c0_53, %c0_54, %c34] : memref<2x4x290xf32, #tpu.memory_space<vmem>>, vector<1x4x256xf32>
    %85 = vector.shape_cast %84 : vector<1x4x256xf32> to vector<4x256xf32>
    %86 = vector.broadcast %29 : vector<1x256xf32> to vector<4x256xf32>
    %87 = arith.mulf %85, %86 : vector<4x256xf32>
    %c0_55 = arith.constant 0 : index
    %c32_56 = arith.constant 32 : index
    %88 = vector.load %arg2[%c0_55, %c32_56] : memref<4x36xf32, #tpu.memory_space<vmem>>, vector<4x4xf32>
    %cst_57 = arith.constant dense<0.000000e+00> : vector<4x256xf32>
    %89 = tpu.matmul %88, %87, %cst_57 {dimension_numbers = #tpu.dot_dimension_numbers<[1], [0], [0], [1], [0, 0, 1, 1], [], []>} : vector<4x4xf32>, vector<4x256xf32>, vector<4x256xf32> -> vector<4x256xf32>
    %90 = arith.addf %83, %89 : vector<4x256xf32>
    %cst_58 = arith.constant dense<0.000000e+00> : vector<4xf32>
    %91 = vector.multi_reduction <add>, %90, %cst_58 [1] : vector<4x256xf32> to vector<4xf32>
    %92 = vector.shape_cast %91 : vector<4xf32> to vector<4x1xf32>
    %cst_59 = arith.constant 3.906250e-03 : f32
    %93 = vector.broadcast %cst_59 : f32 to vector<4x1xf32>
    %94 = arith.mulf %92, %93 : vector<4x1xf32>
    %95 = vector.broadcast %94 : vector<4x1xf32> to vector<4x256xf32>
    %96 = arith.subf %90, %95 : vector<4x256xf32>
    %97 = arith.mulf %96, %96 : vector<4x256xf32>
    %cst_60 = arith.constant dense<0.000000e+00> : vector<4xf32>
    %98 = vector.multi_reduction <add>, %97, %cst_60 [1] : vector<4x256xf32> to vector<4xf32>
    %99 = vector.shape_cast %98 : vector<4xf32> to vector<4x1xf32>
    %cst_61 = arith.constant 3.906250e-03 : f32
    %100 = vector.broadcast %cst_61 : f32 to vector<4x1xf32>
    %101 = arith.mulf %99, %100 : vector<4x1xf32>
    %cst_62 = arith.constant 9.99999974E-6 : f32
    %102 = vector.broadcast %cst_62 : f32 to vector<4x1xf32>
    %103 = arith.addf %101, %102 : vector<4x1xf32>
    %104 = math.rsqrt %103 : vector<4x1xf32>
    %105 = vector.broadcast %104 : vector<4x1xf32> to vector<4x256xf32>
    %106 = arith.mulf %96, %105 : vector<4x256xf32>
    %cst_63 = arith.constant 0.000000e+00 : f32
    %107 = vector.broadcast %cst_63 : f32 to vector<4x256xf32>
    %108 = arith.maximumf %106, %107 : vector<4x256xf32>
    %c0_64 = arith.constant 0 : index
    %c0_65 = arith.constant 0 : index
    %c17_66 = arith.constant 17 : index
    %109 = vector.load %arg5[%c0_64, %c0_65, %c17_66] : memref<2x4x290xf32, #tpu.memory_space<vmem>>, vector<1x4x256xf32>
    %110 = vector.shape_cast %109 : vector<1x4x256xf32> to vector<4x256xf32>
    %111 = vector.shape_cast %108 : vector<4x256xf32> to vector<1x4x256xf32>
    tpu.vector_store %arg5[%c0_64, %c0_65, %c17_66], %111 {strides = array<i32>} : memref<2x4x290xf32, #tpu.memory_space<vmem>>, vector<1x4x256xf32>,
    %c0_67 = arith.constant 0 : index
    %c0_68 = arith.constant 0 : index
    %c0_69 = arith.constant 0 : index
    %112 = vector.load %arg5[%c0_67, %c0_68, %c0_69] : memref<2x4x290xf32, #tpu.memory_space<vmem>>, vector<1x4x256xf32>
    %113 = vector.shape_cast %112 : vector<1x4x256xf32> to vector<4x256xf32>
    %114 = vector.broadcast %24 : vector<1x256xf32> to vector<4x256xf32>
    %115 = arith.mulf %113, %114 : vector<4x256xf32>
    %c0_70 = arith.constant 0 : index
    %c0_71 = arith.constant 0 : index
    %116 = vector.load %arg3[%c0_70, %c0_71] : memref<4x36xf32, #tpu.memory_space<vmem>>, vector<4x4xf32>
    %cst_72 = arith.constant dense<0.000000e+00> : vector<4x256xf32>
    %117 = tpu.matmul %116, %115, %cst_72 {dimension_numbers = #tpu.dot_dimension_numbers<[1], [0], [0], [1], [0, 0, 1, 1], [], []>} : vector<4x4xf32>, vector<4x256xf32>, vector<4x256xf32> -> vector<4x256xf32>
    %c0_73 = arith.constant 0 : index
    %c0_74 = arith.constant 0 : index
    %c1_75 = arith.constant 1 : index
    %118 = vector.load %arg5[%c0_73, %c0_74, %c1_75] : memref<2x4x290xf32, #tpu.memory_space<vmem>>, vector<1x4x256xf32>
    %119 = vector.shape_cast %118 : vector<1x4x256xf32> to vector<4x256xf32>
    %c0_76 = arith.constant 0 : index
    %c4_77 = arith.constant 4 : index
    %120 = vector.load %arg3[%c0_76, %c4_77] : memref<4x36xf32, #tpu.memory_space<vmem>>, vector<4x4xf32>
    %cst_78 = arith.constant dense<0.000000e+00> : vector<4x256xf32>
    %121 = tpu.matmul %120, %119, %cst_78 {dimension_numbers = #tpu.dot_dimension_numbers<[1], [0], [0], [1], [0, 0, 1, 1], [], []>} : vector<4x4xf32>, vector<4x256xf32>, vector<4x256xf32> -> vector<4x256xf32>
    %122 = arith.addf %117, %121 : vector<4x256xf32>
    %c0_79 = arith.constant 0 : index
    %c0_80 = arith.constant 0 : index
    %c2_81 = arith.constant 2 : index
    %123 = vector.load %arg5[%c0_79, %c0_80, %c2_81] : memref<2x4x290xf32, #tpu.memory_space<vmem>>, vector<1x4x256xf32>
    %124 = vector.shape_cast %123 : vector<1x4x256xf32> to vector<4x256xf32>
    %125 = vector.broadcast %29 : vector<1x256xf32> to vector<4x256xf32>
    %126 = arith.mulf %124, %125 : vector<4x256xf32>
    %c0_82 = arith.constant 0 : index
    %c8_83 = arith.constant 8 : index
    %127 = vector.load %arg3[%c0_82, %c8_83] : memref<4x36xf32, #tpu.memory_space<vmem>>, vector<4x4xf32>
    %cst_84 = arith.constant dense<0.000000e+00> : vector<4x256xf32>
    %128 = tpu.matmul %127, %126, %cst_84 {dimension_numbers = #tpu.dot_dimension_numbers<[1], [0], [0], [1], [0, 0, 1, 1], [], []>} : vector<4x4xf32>, vector<4x256xf32>, vector<4x256xf32> -> vector<4x256xf32>
    %129 = arith.addf %122, %128 : vector<4x256xf32>
    %c0_85 = arith.constant 0 : index
    %c0_86 = arith.constant 0 : index
    %c16_87 = arith.constant 16 : index
    %130 = vector.load %arg5[%c0_85, %c0_86, %c16_87] : memref<2x4x290xf32, #tpu.memory_space<vmem>>, vector<1x4x256xf32>
    %131 = vector.shape_cast %130 : vector<1x4x256xf32> to vector<4x256xf32>
    %132 = vector.broadcast %24 : vector<1x256xf32> to vector<4x256xf32>
    %133 = arith.mulf %131, %132 : vector<4x256xf32>
    %c0_88 = arith.constant 0 : index
    %c12_89 = arith.constant 12 : index
    %134 = vector.load %arg3[%c0_88, %c12_89] : memref<4x36xf32, #tpu.memory_space<vmem>>, vector<4x4xf32>
    %cst_90 = arith.constant dense<0.000000e+00> : vector<4x256xf32>
    %135 = tpu.matmul %134, %133, %cst_90 {dimension_numbers = #tpu.dot_dimension_numbers<[1], [0], [0], [1], [0, 0, 1, 1], [], []>} : vector<4x4xf32>, vector<4x256xf32>, vector<4x256xf32> -> vector<4x256xf32>
    %136 = arith.addf %129, %135 : vector<4x256xf32>
    %c0_91 = arith.constant 0 : index
    %c0_92 = arith.constant 0 : index
    %c17_93 = arith.constant 17 : index
    %137 = vector.load %arg5[%c0_91, %c0_92, %c17_93] : memref<2x4x290xf32, #tpu.memory_space<vmem>>, vector<1x4x256xf32>
    %138 = vector.shape_cast %137 : vector<1x4x256xf32> to vector<4x256xf32>
    %c0_94 = arith.constant 0 : index
    %c16_95 = arith.constant 16 : index
    %139 = vector.load %arg3[%c0_94, %c16_95] : memref<4x36xf32, #tpu.memory_space<vmem>>, vector<4x4xf32>
    %cst_96 = arith.constant dense<0.000000e+00> : vector<4x256xf32>
    %140 = tpu.matmul %139, %138, %cst_96 {dimension_numbers = #tpu.dot_dimension_numbers<[1], [0], [0], [1], [0, 0, 1, 1], [], []>} : vector<4x4xf32>, vector<4x256xf32>, vector<4x256xf32> -> vector<4x256xf32>
    %141 = arith.addf %136, %140 : vector<4x256xf32>
    %c0_97 = arith.constant 0 : index
    %c0_98 = arith.constant 0 : index
    %c18_99 = arith.constant 18 : index
    %142 = vector.load %arg5[%c0_97, %c0_98, %c18_99] : memref<2x4x290xf32, #tpu.memory_space<vmem>>, vector<1x4x256xf32>
    %143 = vector.shape_cast %142 : vector<1x4x256xf32> to vector<4x256xf32>
    %144 = vector.broadcast %29 : vector<1x256xf32> to vector<4x256xf32>
    %145 = arith.mulf %143, %144 : vector<4x256xf32>
    %c0_100 = arith.constant 0 : index
    %c20_101 = arith.constant 20 : index
    %146 = vector.load %arg3[%c0_100, %c20_101] : memref<4x36xf32, #tpu.memory_space<vmem>>, vector<4x4xf32>
    %cst_102 = arith.constant dense<0.000000e+00> : vector<4x256xf32>
    %147 = tpu.matmul %146, %145, %cst_102 {dimension_numbers = #tpu.dot_dimension_numbers<[1], [0], [0], [1], [0, 0, 1, 1], [], []>} : vector<4x4xf32>, vector<4x256xf32>, vector<4x256xf32> -> vector<4x256xf32>
    %148 = arith.addf %141, %147 : vector<4x256xf32>
    %c0_103 = arith.constant 0 : index
    %c0_104 = arith.constant 0 : index
    %c32_105 = arith.constant 32 : index
    %149 = vector.load %arg5[%c0_103, %c0_104, %c32_105] : memref<2x4x290xf32, #tpu.memory_space<vmem>>, vector<1x4x256xf32>
    %150 = vector.shape_cast %149 : vector<1x4x256xf32> to vector<4x256xf32>
    %151 = vector.broadcast %24 : vector<1x256xf32> to vector<4x256xf32>
    %152 = arith.mulf %150, %151 : vector<4x256xf32>
    %c0_106 = arith.constant 0 : index
    %c24_107 = arith.constant 24 : index
    %153 = vector.load %arg3[%c0_106, %c24_107] : memref<4x36xf32, #tpu.memory_space<vmem>>, vector<4x4xf32>
    %cst_108 = arith.constant dense<0.000000e+00> : vector<4x256xf32>
    %154 = tpu.matmul %153, %152, %cst_108 {dimension_numbers = #tpu.dot_dimension_numbers<[1], [0], [0], [1], [0, 0, 1, 1], [], []>} : vector<4x4xf32>, vector<4x256xf32>, vector<4x256xf32> -> vector<4x256xf32>
    %155 = arith.addf %148, %154 : vector<4x256xf32>
    %c0_109 = arith.constant 0 : index
    %c0_110 = arith.constant 0 : index
    %c33_111 = arith.constant 33 : index
    %156 = vector.load %arg5[%c0_109, %c0_110, %c33_111] : memref<2x4x290xf32, #tpu.memory_space<vmem>>, vector<1x4x256xf32>
    %157 = vector.shape_cast %156 : vector<1x4x256xf32> to vector<4x256xf32>
    %c0_112 = arith.constant 0 : index
    %c28_113 = arith.constant 28 : index
    %158 = vector.load %arg3[%c0_112, %c28_113] : memref<4x36xf32, #tpu.memory_space<vmem>>, vector<4x4xf32>
    %cst_114 = arith.constant dense<0.000000e+00> : vector<4x256xf32>
    %159 = tpu.matmul %158, %157, %cst_114 {dimension_numbers = #tpu.dot_dimension_numbers<[1], [0], [0], [1], [0, 0, 1, 1], [], []>} : vector<4x4xf32>, vector<4x256xf32>, vector<4x256xf32> -> vector<4x256xf32>
    %160 = arith.addf %155, %159 : vector<4x256xf32>
    %c0_115 = arith.constant 0 : index
    %c0_116 = arith.constant 0 : index
    %c34_117 = arith.constant 34 : index
    %161 = vector.load %arg5[%c0_115, %c0_116, %c34_117] : memref<2x4x290xf32, #tpu.memory_space<vmem>>, vector<1x4x256xf32>
    %162 = vector.shape_cast %161 : vector<1x4x256xf32> to vector<4x256xf32>
    %163 = vector.broadcast %29 : vector<1x256xf32> to vector<4x256xf32>
    %164 = arith.mulf %162, %163 : vector<4x256xf32>
    %c0_118 = arith.constant 0 : index
    %c32_119 = arith.constant 32 : index
    %165 = vector.load %arg3[%c0_118, %c32_119] : memref<4x36xf32, #tpu.memory_space<vmem>>, vector<4x4xf32>
    %cst_120 = arith.constant dense<0.000000e+00> : vector<4x256xf32>
    %166 = tpu.matmul %165, %164, %cst_120 {dimension_numbers = #tpu.dot_dimension_numbers<[1], [0], [0], [1], [0, 0, 1, 1], [], []>} : vector<4x4xf32>, vector<4x256xf32>, vector<4x256xf32> -> vector<4x256xf32>
    %167 = arith.addf %160, %166 : vector<4x256xf32>
    %cst_121 = arith.constant dense<0.000000e+00> : vector<4xf32>
    %168 = vector.multi_reduction <add>, %167, %cst_121 [1] : vector<4x256xf32> to vector<4xf32>
    %169 = vector.shape_cast %168 : vector<4xf32> to vector<4x1xf32>
    %cst_122 = arith.constant 3.906250e-03 : f32
    %170 = vector.broadcast %cst_122 : f32 to vector<4x1xf32>
    %171 = arith.mulf %169, %170 : vector<4x1xf32>
    %172 = vector.broadcast %171 : vector<4x1xf32> to vector<4x256xf32>
    %173 = arith.subf %167, %172 : vector<4x256xf32>
    %174 = arith.mulf %173, %173 : vector<4x256xf32>
    %cst_123 = arith.constant dense<0.000000e+00> : vector<4xf32>
    %175 = vector.multi_reduction <add>, %174, %cst_123 [1] : vector<4x256xf32> to vector<4xf32>
    %176 = vector.shape_cast %175 : vector<4xf32> to vector<4x1xf32>
    %cst_124 = arith.constant 3.906250e-03 : f32
    %177 = vector.broadcast %cst_124 : f32 to vector<4x1xf32>
    %178 = arith.mulf %176, %177 : vector<4x1xf32>
    %cst_125 = arith.constant 9.99999974E-6 : f32
    %179 = vector.broadcast %cst_125 : f32 to vector<4x1xf32>
    %180 = arith.addf %178, %179 : vector<4x1xf32>
    %181 = math.rsqrt %180 : vector<4x1xf32>
    %182 = vector.broadcast %181 : vector<4x1xf32> to vector<4x256xf32>
    %183 = arith.mulf %173, %182 : vector<4x256xf32>
    %184 = arith.addf %31, %183 : vector<4x256xf32>
    %c0_126 = arith.constant 0 : index
    %c0_127 = arith.constant 0 : index
    %c0_128 = arith.constant 0 : index
    %185 = vector.load %arg4[%c0_126, %c0_127, %c0_128] : memref<2x4x256xf32, #tpu.memory_space<vmem>>, vector<1x4x256xf32>
    %186 = vector.shape_cast %185 : vector<1x4x256xf32> to vector<4x256xf32>
    %187 = vector.shape_cast %184 : vector<4x256xf32> to vector<1x4x256xf32>
    tpu.vector_store %arg4[%c0_126, %c0_127, %c0_128], %187 {strides = array<i32>} : memref<2x4x256xf32, #tpu.memory_space<vmem>>, vector<1x4x256xf32>,
    %c1_129 = arith.constant 1 : index
    %c0_130 = arith.constant 0 : index
    %c0_131 = arith.constant 0 : index
    %188 = vector.load %arg1[%c1_129, %c0_130, %c0_131] : memref<2x4x256xf32, #tpu.memory_space<vmem>>, vector<1x4x256xf32>
    %189 = vector.shape_cast %188 : vector<1x4x256xf32> to vector<4x256xf32>
    %c1_132 = arith.constant 1 : index
    %c0_133 = arith.constant 0 : index
    %c17_134 = arith.constant 17 : index
    %190 = vector.load %arg5[%c1_132, %c0_133, %c17_134] : memref<2x4x290xf32, #tpu.memory_space<vmem>>, vector<1x4x256xf32>
    %191 = vector.shape_cast %190 : vector<1x4x256xf32> to vector<4x256xf32>
    %192 = vector.shape_cast %189 : vector<4x256xf32> to vector<1x4x256xf32>
    tpu.vector_store %arg5[%c1_132, %c0_133, %c17_134], %192 {strides = array<i32>} : memref<2x4x290xf32, #tpu.memory_space<vmem>>, vector<1x4x256xf32>,
    %c1_135 = arith.constant 1 : index
    %c0_136 = arith.constant 0 : index
    %c0_137 = arith.constant 0 : index
    %193 = vector.load %arg5[%c1_135, %c0_136, %c0_137] : memref<2x4x290xf32, #tpu.memory_space<vmem>>, vector<1x4x256xf32>
    %194 = vector.shape_cast %193 : vector<1x4x256xf32> to vector<4x256xf32>
    %195 = vector.broadcast %24 : vector<1x256xf32> to vector<4x256xf32>
    %196 = arith.mulf %194, %195 : vector<4x256xf32>
    %c0_138 = arith.constant 0 : index
    %c0_139 = arith.constant 0 : index
    %197 = vector.load %arg2[%c0_138, %c0_139] : memref<4x36xf32, #tpu.memory_space<vmem>>, vector<4x4xf32>
    %cst_140 = arith.constant dense<0.000000e+00> : vector<4x256xf32>
    %198 = tpu.matmul %197, %196, %cst_140 {dimension_numbers = #tpu.dot_dimension_numbers<[1], [0], [0], [1], [0, 0, 1, 1], [], []>} : vector<4x4xf32>, vector<4x256xf32>, vector<4x256xf32> -> vector<4x256xf32>
    %c1_141 = arith.constant 1 : index
    %c0_142 = arith.constant 0 : index
    %c1_143 = arith.constant 1 : index
    %199 = vector.load %arg5[%c1_141, %c0_142, %c1_143] : memref<2x4x290xf32, #tpu.memory_space<vmem>>, vector<1x4x256xf32>
    %200 = vector.shape_cast %199 : vector<1x4x256xf32> to vector<4x256xf32>
    %c0_144 = arith.constant 0 : index
    %c4_145 = arith.constant 4 : index
    %201 = vector.load %arg2[%c0_144, %c4_145] : memref<4x36xf32, #tpu.memory_space<vmem>>, vector<4x4xf32>
    %cst_146 = arith.constant dense<0.000000e+00> : vector<4x256xf32>
    %202 = tpu.matmul %201, %200, %cst_146 {dimension_numbers = #tpu.dot_dimension_numbers<[1], [0], [0], [1], [0, 0, 1, 1], [], []>} : vector<4x4xf32>, vector<4x256xf32>, vector<4x256xf32> -> vector<4x256xf32>
    %203 = arith.addf %198, %202 : vector<4x256xf32>
    %c1_147 = arith.constant 1 : index
    %c0_148 = arith.constant 0 : index
    %c2_149 = arith.constant 2 : index
    %204 = vector.load %arg5[%c1_147, %c0_148, %c2_149] : memref<2x4x290xf32, #tpu.memory_space<vmem>>, vector<1x4x256xf32>
    %205 = vector.shape_cast %204 : vector<1x4x256xf32> to vector<4x256xf32>
    %206 = vector.broadcast %29 : vector<1x256xf32> to vector<4x256xf32>
    %207 = arith.mulf %205, %206 : vector<4x256xf32>
    %c0_150 = arith.constant 0 : index
    %c8_151 = arith.constant 8 : index
    %208 = vector.load %arg2[%c0_150, %c8_151] : memref<4x36xf32, #tpu.memory_space<vmem>>, vector<4x4xf32>
    %cst_152 = arith.constant dense<0.000000e+00> : vector<4x256xf32>
    %209 = tpu.matmul %208, %207, %cst_152 {dimension_numbers = #tpu.dot_dimension_numbers<[1], [0], [0], [1], [0, 0, 1, 1], [], []>} : vector<4x4xf32>, vector<4x256xf32>, vector<4x256xf32> -> vector<4x256xf32>
    %210 = arith.addf %203, %209 : vector<4x256xf32>
    %c1_153 = arith.constant 1 : index
    %c0_154 = arith.constant 0 : index
    %c16_155 = arith.constant 16 : index
    %211 = vector.load %arg5[%c1_153, %c0_154, %c16_155] : memref<2x4x290xf32, #tpu.memory_space<vmem>>, vector<1x4x256xf32>
    %212 = vector.shape_cast %211 : vector<1x4x256xf32> to vector<4x256xf32>
    %213 = vector.broadcast %24 : vector<1x256xf32> to vector<4x256xf32>
    %214 = arith.mulf %212, %213 : vector<4x256xf32>
    %c0_156 = arith.constant 0 : index
    %c12_157 = arith.constant 12 : index
    %215 = vector.load %arg2[%c0_156, %c12_157] : memref<4x36xf32, #tpu.memory_space<vmem>>, vector<4x4xf32>
    %cst_158 = arith.constant dense<0.000000e+00> : vector<4x256xf32>
    %216 = tpu.matmul %215, %214, %cst_158 {dimension_numbers = #tpu.dot_dimension_numbers<[1], [0], [0], [1], [0, 0, 1, 1], [], []>} : vector<4x4xf32>, vector<4x256xf32>, vector<4x256xf32> -> vector<4x256xf32>
    %217 = arith.addf %210, %216 : vector<4x256xf32>
    %c1_159 = arith.constant 1 : index
    %c0_160 = arith.constant 0 : index
    %c17_161 = arith.constant 17 : index
    %218 = vector.load %arg5[%c1_159, %c0_160, %c17_161] : memref<2x4x290xf32, #tpu.memory_space<vmem>>, vector<1x4x256xf32>
    %219 = vector.shape_cast %218 : vector<1x4x256xf32> to vector<4x256xf32>
    %c0_162 = arith.constant 0 : index
    %c16_163 = arith.constant 16 : index
    %220 = vector.load %arg2[%c0_162, %c16_163] : memref<4x36xf32, #tpu.memory_space<vmem>>, vector<4x4xf32>
    %cst_164 = arith.constant dense<0.000000e+00> : vector<4x256xf32>
    %221 = tpu.matmul %220, %219, %cst_164 {dimension_numbers = #tpu.dot_dimension_numbers<[1], [0], [0], [1], [0, 0, 1, 1], [], []>} : vector<4x4xf32>, vector<4x256xf32>, vector<4x256xf32> -> vector<4x256xf32>
    %222 = arith.addf %217, %221 : vector<4x256xf32>
    %c1_165 = arith.constant 1 : index
    %c0_166 = arith.constant 0 : index
    %c18_167 = arith.constant 18 : index
    %223 = vector.load %arg5[%c1_165, %c0_166, %c18_167] : memref<2x4x290xf32, #tpu.memory_space<vmem>>, vector<1x4x256xf32>
    %224 = vector.shape_cast %223 : vector<1x4x256xf32> to vector<4x256xf32>
    %225 = vector.broadcast %29 : vector<1x256xf32> to vector<4x256xf32>
    %226 = arith.mulf %224, %225 : vector<4x256xf32>
    %c0_168 = arith.constant 0 : index
    %c20_169 = arith.constant 20 : index
    %227 = vector.load %arg2[%c0_168, %c20_169] : memref<4x36xf32, #tpu.memory_space<vmem>>, vector<4x4xf32>
    %cst_170 = arith.constant dense<0.000000e+00> : vector<4x256xf32>
    %228 = tpu.matmul %227, %226, %cst_170 {dimension_numbers = #tpu.dot_dimension_numbers<[1], [0], [0], [1], [0, 0, 1, 1], [], []>} : vector<4x4xf32>, vector<4x256xf32>, vector<4x256xf32> -> vector<4x256xf32>
    %229 = arith.addf %222, %228 : vector<4x256xf32>
    %c1_171 = arith.constant 1 : index
    %c0_172 = arith.constant 0 : index
    %c32_173 = arith.constant 32 : index
    %230 = vector.load %arg5[%c1_171, %c0_172, %c32_173] : memref<2x4x290xf32, #tpu.memory_space<vmem>>, vector<1x4x256xf32>
    %231 = vector.shape_cast %230 : vector<1x4x256xf32> to vector<4x256xf32>
    %232 = vector.broadcast %24 : vector<1x256xf32> to vector<4x256xf32>
    %233 = arith.mulf %231, %232 : vector<4x256xf32>
    %c0_174 = arith.constant 0 : index
    %c24_175 = arith.constant 24 : index
    %234 = vector.load %arg2[%c0_174, %c24_175] : memref<4x36xf32, #tpu.memory_space<vmem>>, vector<4x4xf32>
    %cst_176 = arith.constant dense<0.000000e+00> : vector<4x256xf32>
    %235 = tpu.matmul %234, %233, %cst_176 {dimension_numbers = #tpu.dot_dimension_numbers<[1], [0], [0], [1], [0, 0, 1, 1], [], []>} : vector<4x4xf32>, vector<4x256xf32>, vector<4x256xf32> -> vector<4x256xf32>
    %236 = arith.addf %229, %235 : vector<4x256xf32>
    %c1_177 = arith.constant 1 : index
    %c0_178 = arith.constant 0 : index
    %c33_179 = arith.constant 33 : index
    %237 = vector.load %arg5[%c1_177, %c0_178, %c33_179] : memref<2x4x290xf32, #tpu.memory_space<vmem>>, vector<1x4x256xf32>
    %238 = vector.shape_cast %237 : vector<1x4x256xf32> to vector<4x256xf32>
    %c0_180 = arith.constant 0 : index
    %c28_181 = arith.constant 28 : index
    %239 = vector.load %arg2[%c0_180, %c28_181] : memref<4x36xf32, #tpu.memory_space<vmem>>, vector<4x4xf32>
    %cst_182 = arith.constant dense<0.000000e+00> : vector<4x256xf32>
    %240 = tpu.matmul %239, %238, %cst_182 {dimension_numbers = #tpu.dot_dimension_numbers<[1], [0], [0], [1], [0, 0, 1, 1], [], []>} : vector<4x4xf32>, vector<4x256xf32>, vector<4x256xf32> -> vector<4x256xf32>
    %241 = arith.addf %236, %240 : vector<4x256xf32>
    %c1_183 = arith.constant 1 : index
    %c0_184 = arith.constant 0 : index
    %c34_185 = arith.constant 34 : index
    %242 = vector.load %arg5[%c1_183, %c0_184, %c34_185] : memref<2x4x290xf32, #tpu.memory_space<vmem>>, vector<1x4x256xf32>
    %243 = vector.shape_cast %242 : vector<1x4x256xf32> to vector<4x256xf32>
    %244 = vector.broadcast %29 : vector<1x256xf32> to vector<4x256xf32>
    %245 = arith.mulf %243, %244 : vector<4x256xf32>
    %c0_186 = arith.constant 0 : index
    %c32_187 = arith.constant 32 : index
    %246 = vector.load %arg2[%c0_186, %c32_187] : memref<4x36xf32, #tpu.memory_space<vmem>>, vector<4x4xf32>
    %cst_188 = arith.constant dense<0.000000e+00> : vector<4x256xf32>
    %247 = tpu.matmul %246, %245, %cst_188 {dimension_numbers = #tpu.dot_dimension_numbers<[1], [0], [0], [1], [0, 0, 1, 1], [], []>} : vector<4x4xf32>, vector<4x256xf32>, vector<4x256xf32> -> vector<4x256xf32>
    %248 = arith.addf %241, %247 : vector<4x256xf32>
    %cst_189 = arith.constant dense<0.000000e+00> : vector<4xf32>
    %249 = vector.multi_reduction <add>, %248, %cst_189 [1] : vector<4x256xf32> to vector<4xf32>
    %250 = vector.shape_cast %249 : vector<4xf32> to vector<4x1xf32>
    %cst_190 = arith.constant 3.906250e-03 : f32
    %251 = vector.broadcast %cst_190 : f32 to vector<4x1xf32>
    %252 = arith.mulf %250, %251 : vector<4x1xf32>
    %253 = vector.broadcast %252 : vector<4x1xf32> to vector<4x256xf32>
    %254 = arith.subf %248, %253 : vector<4x256xf32>
    %255 = arith.mulf %254, %254 : vector<4x256xf32>
    %cst_191 = arith.constant dense<0.000000e+00> : vector<4xf32>
    %256 = vector.multi_reduction <add>, %255, %cst_191 [1] : vector<4x256xf32> to vector<4xf32>
    %257 = vector.shape_cast %256 : vector<4xf32> to vector<4x1xf32>
    %cst_192 = arith.constant 3.906250e-03 : f32
    %258 = vector.broadcast %cst_192 : f32 to vector<4x1xf32>
    %259 = arith.mulf %257, %258 : vector<4x1xf32>
    %cst_193 = arith.constant 9.99999974E-6 : f32
    %260 = vector.broadcast %cst_193 : f32 to vector<4x1xf32>
    %261 = arith.addf %259, %260 : vector<4x1xf32>
    %262 = math.rsqrt %261 : vector<4x1xf32>
    %263 = vector.broadcast %262 : vector<4x1xf32> to vector<4x256xf32>
    %264 = arith.mulf %254, %263 : vector<4x256xf32>
    %cst_194 = arith.constant 0.000000e+00 : f32
    %265 = vector.broadcast %cst_194 : f32 to vector<4x256xf32>
    %266 = arith.maximumf %264, %265 : vector<4x256xf32>
    %c1_195 = arith.constant 1 : index
    %c0_196 = arith.constant 0 : index
    %c17_197 = arith.constant 17 : index
    %267 = vector.load %arg5[%c1_195, %c0_196, %c17_197] : memref<2x4x290xf32, #tpu.memory_space<vmem>>, vector<1x4x256xf32>
    %268 = vector.shape_cast %267 : vector<1x4x256xf32> to vector<4x256xf32>
    %269 = vector.shape_cast %266 : vector<4x256xf32> to vector<1x4x256xf32>
    tpu.vector_store %arg5[%c1_195, %c0_196, %c17_197], %269 {strides = array<i32>} : memref<2x4x290xf32, #tpu.memory_space<vmem>>, vector<1x4x256xf32>,
    %c1_198 = arith.constant 1 : index
    %c0_199 = arith.constant 0 : index
    %c0_200 = arith.constant 0 : index
    %270 = vector.load %arg5[%c1_198, %c0_199, %c0_200] : memref<2x4x290xf32, #tpu.memory_space<vmem>>, vector<1x4x256xf32>
    %271 = vector.shape_cast %270 : vector<1x4x256xf32> to vector<4x256xf32>
    %272 = vector.broadcast %24 : vector<1x256xf32> to vector<4x256xf32>
    %273 = arith.mulf %271, %272 : vector<4x256xf32>
    %c0_201 = arith.constant 0 : index
    %c0_202 = arith.constant 0 : index
    %274 = vector.load %arg3[%c0_201, %c0_202] : memref<4x36xf32, #tpu.memory_space<vmem>>, vector<4x4xf32>
    %cst_203 = arith.constant dense<0.000000e+00> : vector<4x256xf32>
    %275 = tpu.matmul %274, %273, %cst_203 {dimension_numbers = #tpu.dot_dimension_numbers<[1], [0], [0], [1], [0, 0, 1, 1], [], []>} : vector<4x4xf32>, vector<4x256xf32>, vector<4x256xf32> -> vector<4x256xf32>
    %c1_204 = arith.constant 1 : index
    %c0_205 = arith.constant 0 : index
    %c1_206 = arith.constant 1 : index
    %276 = vector.load %arg5[%c1_204, %c0_205, %c1_206] : memref<2x4x290xf32, #tpu.memory_space<vmem>>, vector<1x4x256xf32>
    %277 = vector.shape_cast %276 : vector<1x4x256xf32> to vector<4x256xf32>
    %c0_207 = arith.constant 0 : index
    %c4_208 = arith.constant 4 : index
    %278 = vector.load %arg3[%c0_207, %c4_208] : memref<4x36xf32, #tpu.memory_space<vmem>>, vector<4x4xf32>
    %cst_209 = arith.constant dense<0.000000e+00> : vector<4x256xf32>
    %279 = tpu.matmul %278, %277, %cst_209 {dimension_numbers = #tpu.dot_dimension_numbers<[1], [0], [0], [1], [0, 0, 1, 1], [], []>} : vector<4x4xf32>, vector<4x256xf32>, vector<4x256xf32> -> vector<4x256xf32>
    %280 = arith.addf %275, %279 : vector<4x256xf32>
    %c1_210 = arith.constant 1 : index
    %c0_211 = arith.constant 0 : index
    %c2_212 = arith.constant 2 : index
    %281 = vector.load %arg5[%c1_210, %c0_211, %c2_212] : memref<2x4x290xf32, #tpu.memory_space<vmem>>, vector<1x4x256xf32>
    %282 = vector.shape_cast %281 : vector<1x4x256xf32> to vector<4x256xf32>
    %283 = vector.broadcast %29 : vector<1x256xf32> to vector<4x256xf32>
    %284 = arith.mulf %282, %283 : vector<4x256xf32>
    %c0_213 = arith.constant 0 : index
    %c8_214 = arith.constant 8 : index
    %285 = vector.load %arg3[%c0_213, %c8_214] : memref<4x36xf32, #tpu.memory_space<vmem>>, vector<4x4xf32>
    %cst_215 = arith.constant dense<0.000000e+00> : vector<4x256xf32>
    %286 = tpu.matmul %285, %284, %cst_215 {dimension_numbers = #tpu.dot_dimension_numbers<[1], [0], [0], [1], [0, 0, 1, 1], [], []>} : vector<4x4xf32>, vector<4x256xf32>, vector<4x256xf32> -> vector<4x256xf32>
    %287 = arith.addf %280, %286 : vector<4x256xf32>
    %c1_216 = arith.constant 1 : index
    %c0_217 = arith.constant 0 : index
    %c16_218 = arith.constant 16 : index
    %288 = vector.load %arg5[%c1_216, %c0_217, %c16_218] : memref<2x4x290xf32, #tpu.memory_space<vmem>>, vector<1x4x256xf32>
    %289 = vector.shape_cast %288 : vector<1x4x256xf32> to vector<4x256xf32>
    %290 = vector.broadcast %24 : vector<1x256xf32> to vector<4x256xf32>
    %291 = arith.mulf %289, %290 : vector<4x256xf32>
    %c0_219 = arith.constant 0 : index
    %c12_220 = arith.constant 12 : index
    %292 = vector.load %arg3[%c0_219, %c12_220] : memref<4x36xf32, #tpu.memory_space<vmem>>, vector<4x4xf32>
    %cst_221 = arith.constant dense<0.000000e+00> : vector<4x256xf32>
    %293 = tpu.matmul %292, %291, %cst_221 {dimension_numbers = #tpu.dot_dimension_numbers<[1], [0], [0], [1], [0, 0, 1, 1], [], []>} : vector<4x4xf32>, vector<4x256xf32>, vector<4x256xf32> -> vector<4x256xf32>
    %294 = arith.addf %287, %293 : vector<4x256xf32>
    %c1_222 = arith.constant 1 : index
    %c0_223 = arith.constant 0 : index
    %c17_224 = arith.constant 17 : index
    %295 = vector.load %arg5[%c1_222, %c0_223, %c17_224] : memref<2x4x290xf32, #tpu.memory_space<vmem>>, vector<1x4x256xf32>
    %296 = vector.shape_cast %295 : vector<1x4x256xf32> to vector<4x256xf32>
    %c0_225 = arith.constant 0 : index
    %c16_226 = arith.constant 16 : index
    %297 = vector.load %arg3[%c0_225, %c16_226] : memref<4x36xf32, #tpu.memory_space<vmem>>, vector<4x4xf32>
    %cst_227 = arith.constant dense<0.000000e+00> : vector<4x256xf32>
    %298 = tpu.matmul %297, %296, %cst_227 {dimension_numbers = #tpu.dot_dimension_numbers<[1], [0], [0], [1], [0, 0, 1, 1], [], []>} : vector<4x4xf32>, vector<4x256xf32>, vector<4x256xf32> -> vector<4x256xf32>
    %299 = arith.addf %294, %298 : vector<4x256xf32>
    %c1_228 = arith.constant 1 : index
    %c0_229 = arith.constant 0 : index
    %c18_230 = arith.constant 18 : index
    %300 = vector.load %arg5[%c1_228, %c0_229, %c18_230] : memref<2x4x290xf32, #tpu.memory_space<vmem>>, vector<1x4x256xf32>
    %301 = vector.shape_cast %300 : vector<1x4x256xf32> to vector<4x256xf32>
    %302 = vector.broadcast %29 : vector<1x256xf32> to vector<4x256xf32>
    %303 = arith.mulf %301, %302 : vector<4x256xf32>
    %c0_231 = arith.constant 0 : index
    %c20_232 = arith.constant 20 : index
    %304 = vector.load %arg3[%c0_231, %c20_232] : memref<4x36xf32, #tpu.memory_space<vmem>>, vector<4x4xf32>
    %cst_233 = arith.constant dense<0.000000e+00> : vector<4x256xf32>
    %305 = tpu.matmul %304, %303, %cst_233 {dimension_numbers = #tpu.dot_dimension_numbers<[1], [0], [0], [1], [0, 0, 1, 1], [], []>} : vector<4x4xf32>, vector<4x256xf32>, vector<4x256xf32> -> vector<4x256xf32>
    %306 = arith.addf %299, %305 : vector<4x256xf32>
    %c1_234 = arith.constant 1 : index
    %c0_235 = arith.constant 0 : index
    %c32_236 = arith.constant 32 : index
    %307 = vector.load %arg5[%c1_234, %c0_235, %c32_236] : memref<2x4x290xf32, #tpu.memory_space<vmem>>, vector<1x4x256xf32>
    %308 = vector.shape_cast %307 : vector<1x4x256xf32> to vector<4x256xf32>
    %309 = vector.broadcast %24 : vector<1x256xf32> to vector<4x256xf32>
    %310 = arith.mulf %308, %309 : vector<4x256xf32>
    %c0_237 = arith.constant 0 : index
    %c24_238 = arith.constant 24 : index
    %311 = vector.load %arg3[%c0_237, %c24_238] : memref<4x36xf32, #tpu.memory_space<vmem>>, vector<4x4xf32>
    %cst_239 = arith.constant dense<0.000000e+00> : vector<4x256xf32>
    %312 = tpu.matmul %311, %310, %cst_239 {dimension_numbers = #tpu.dot_dimension_numbers<[1], [0], [0], [1], [0, 0, 1, 1], [], []>} : vector<4x4xf32>, vector<4x256xf32>, vector<4x256xf32> -> vector<4x256xf32>
    %313 = arith.addf %306, %312 : vector<4x256xf32>
    %c1_240 = arith.constant 1 : index
    %c0_241 = arith.constant 0 : index
    %c33_242 = arith.constant 33 : index
    %314 = vector.load %arg5[%c1_240, %c0_241, %c33_242] : memref<2x4x290xf32, #tpu.memory_space<vmem>>, vector<1x4x256xf32>
    %315 = vector.shape_cast %314 : vector<1x4x256xf32> to vector<4x256xf32>
    %c0_243 = arith.constant 0 : index
    %c28_244 = arith.constant 28 : index
    %316 = vector.load %arg3[%c0_243, %c28_244] : memref<4x36xf32, #tpu.memory_space<vmem>>, vector<4x4xf32>
    %cst_245 = arith.constant dense<0.000000e+00> : vector<4x256xf32>
    %317 = tpu.matmul %316, %315, %cst_245 {dimension_numbers = #tpu.dot_dimension_numbers<[1], [0], [0], [1], [0, 0, 1, 1], [], []>} : vector<4x4xf32>, vector<4x256xf32>, vector<4x256xf32> -> vector<4x256xf32>
    %318 = arith.addf %313, %317 : vector<4x256xf32>
    %c1_246 = arith.constant 1 : index
    %c0_247 = arith.constant 0 : index
    %c34_248 = arith.constant 34 : index
    %319 = vector.load %arg5[%c1_246, %c0_247, %c34_248] : memref<2x4x290xf32, #tpu.memory_space<vmem>>, vector<1x4x256xf32>
    %320 = vector.shape_cast %319 : vector<1x4x256xf32> to vector<4x256xf32>
    %321 = vector.broadcast %29 : vector<1x256xf32> to vector<4x256xf32>
    %322 = arith.mulf %320, %321 : vector<4x256xf32>
    %c0_249 = arith.constant 0 : index
    %c32_250 = arith.constant 32 : index
    %323 = vector.load %arg3[%c0_249, %c32_250] : memref<4x36xf32, #tpu.memory_space<vmem>>, vector<4x4xf32>
    %cst_251 = arith.constant dense<0.000000e+00> : vector<4x256xf32>
    %324 = tpu.matmul %323, %322, %cst_251 {dimension_numbers = #tpu.dot_dimension_numbers<[1], [0], [0], [1], [0, 0, 1, 1], [], []>} : vector<4x4xf32>, vector<4x256xf32>, vector<4x256xf32> -> vector<4x256xf32>
    %325 = arith.addf %318, %324 : vector<4x256xf32>
    %cst_252 = arith.constant dense<0.000000e+00> : vector<4xf32>
    %326 = vector.multi_reduction <add>, %325, %cst_252 [1] : vector<4x256xf32> to vector<4xf32>
    %327 = vector.shape_cast %326 : vector<4xf32> to vector<4x1xf32>
    %cst_253 = arith.constant 3.906250e-03 : f32
    %328 = vector.broadcast %cst_253 : f32 to vector<4x1xf32>
    %329 = arith.mulf %327, %328 : vector<4x1xf32>
    %330 = vector.broadcast %329 : vector<4x1xf32> to vector<4x256xf32>
    %331 = arith.subf %325, %330 : vector<4x256xf32>
    %332 = arith.mulf %331, %331 : vector<4x256xf32>
    %cst_254 = arith.constant dense<0.000000e+00> : vector<4xf32>
    %333 = vector.multi_reduction <add>, %332, %cst_254 [1] : vector<4x256xf32> to vector<4xf32>
    %334 = vector.shape_cast %333 : vector<4xf32> to vector<4x1xf32>
    %cst_255 = arith.constant 3.906250e-03 : f32
    %335 = vector.broadcast %cst_255 : f32 to vector<4x1xf32>
    %336 = arith.mulf %334, %335 : vector<4x1xf32>
    %cst_256 = arith.constant 9.99999974E-6 : f32
    %337 = vector.broadcast %cst_256 : f32 to vector<4x1xf32>
    %338 = arith.addf %336, %337 : vector<4x1xf32>
    %339 = math.rsqrt %338 : vector<4x1xf32>
    %340 = vector.broadcast %339 : vector<4x1xf32> to vector<4x256xf32>
    %341 = arith.mulf %331, %340 : vector<4x256xf32>
    %342 = arith.addf %189, %341 : vector<4x256xf32>
    %c1_257 = arith.constant 1 : index
    %c0_258 = arith.constant 0 : index
    %c0_259 = arith.constant 0 : index
    %343 = vector.load %arg4[%c1_257, %c0_258, %c0_259] : memref<2x4x256xf32, #tpu.memory_space<vmem>>, vector<1x4x256xf32>
    %344 = vector.shape_cast %343 : vector<1x4x256xf32> to vector<4x256xf32>
    %345 = vector.shape_cast %342 : vector<4x256xf32> to vector<1x4x256xf32>
    tpu.vector_store %arg4[%c1_257, %c0_258, %c0_259], %345 {strides = array<i32>} : memref<2x4x256xf32, #tpu.memory_space<vmem>>, vector<1x4x256xf32>,
    return
  }
  func.func @transform_0(%arg0: i32) -> (i32, i32, i32) {
    %c0_i32 = arith.constant 0 : i32
    %c0_i32_0 = arith.constant 0 : i32
    %c0_i32_1 = arith.constant 0 : i32
    return %arg0, %c0_i32, %c0_i32_0 : i32, i32, i32
  }
  func.func @transform_1(%arg0: i32) -> (i32, i32) {
    %c0_i32 = arith.constant 0 : i32
    %c0_i32_0 = arith.constant 0 : i32
    %c0_i32_1 = arith.constant 0 : i32
    return %c0_i32, %c0_i32_0 : i32, i32
  }
  func.func @transform_2(%arg0: i32) -> (i32, i32) {
    %c0_i32 = arith.constant 0 : i32
    %c0_i32_0 = arith.constant 0 : i32
    %c0_i32_1 = arith.constant 0 : i32
    return %c0_i32, %c0_i32_0 : i32, i32
  }
  func.func @transform_3(%arg0: i32) -> (i32, i32, i32) {
    %c0_i32 = arith.constant 0 : i32
    %c0_i32_0 = arith.constant 0 : i32
    %c0_i32_1 = arith.constant 0 : i32
    return %arg0, %c0_i32, %c0_i32_0 : i32, i32, i32
  }
}

</mosaic_0001>

<bundles_post_ra>
// kernel: tpu_custom_call.1
= control target key start
LH: loop header
LB: loop body
LE: loop exit
PB: predicated region body
PF: predicated region fallthrough
CT: control target
= control target key end

     0   :  { %8 = vsyncpa [#allocation4], 0  ;;  %s3771_s0 = inlined_call_operand.hbm [shape: f32[2,4,256], index: 0, kind: input, shape index: {}]   ;;  %s3772_s1 = inlined_call_operand.hbm [shape: f32[4,36], index: 1, kind: input, shape index: {}]   ;;  %s3773_s2 = inlined_call_operand.hbm [shape: f32[4,36], index: 2, kind: input, shape index: {}]   ;;  %s3774_s3 = inlined_call_operand.hbm [shape: f32[2,4,256], index: 3, kind: output, shape index: {}]  }
   0x1   :  { %9 = vsyncpa [#allocation7], 0  ;;  %s29_s14 = sshll.u32 %s3772_s1, 4  ;;  %s30_s14 = int_to_ptr.hbm [resolvable:$true] %s29_s14 }
   0x2   :  { %10 = vsyncpa [#allocation5], 0  ;;  %s3117_s15 = smov [#allocation6]   ;;  %s15_s19 = sshll.u32 %s3771_s0, 4  ;;  %s16_s19 = int_to_ptr.hbm [resolvable:$true] %s15_s19 }
   0x3   :  { %s31_s16 = sshll.u32 %s3117_s15, 4  ;;  %s3118_s20 = smov [#allocation3]   ;;  %s32_s16 = int_to_ptr.vmem [resolvable:$true] %s31_s16 }
   0x4   :  { %34 = dma.hbm_to_vmem [thread:$0]  %s30_s14, 64, %s32_s16, [#allocation7]  }
   0x5   :  { %s17_s21 = sshll.u32 %s3118_s20, 4  ;;  %s3119_s22 = smov 128   ;;  %s18_s21 = int_to_ptr.vmem [resolvable:$true] %s17_s21 }
   0x6   :  { %s3120_s23 = smov 8   ;;  %s40_s25 = sshll.u32 %s3773_s2, 4  ;;  %s41_s25 = int_to_ptr.hbm [resolvable:$true] %s40_s25 }
   0x7   :  { %23 = dma.hbm_to_vmem [thread:$0]  %s16_s19, 256, %s18_s21, [#allocation4], %s3119_s22, %s3119_s22, %s3120_s23  }
   0x8   :  { %s3121_s26 = smov [#allocation8]  }
   0x9   :  { %s42_s27 = sshll.u32 %s3121_s26, 4  ;;  %s43_s27 = int_to_ptr.vmem [resolvable:$true] %s42_s27 }
   0xa   :  { %45 = dma.hbm_to_vmem [thread:$0]  %s41_s25, 64, %s43_s27, [#allocation7]  }
   0xb   :  { %3111 = dma.done.wait [#allocation4], 256  }
   0xc   :  { %3112 = vsyncadd [#allocation4], 4294967040 }
   0xd   :  { %3113 = dma.done.wait [#allocation7], 128  }
   0xe   :  { %3114 = vsyncadd [#allocation7], 4294967168  ;;  %v64_v0 = vlaneseq  ;;  %v99_v5 = vld [vmem:[#allocation3] sm:$0xff]  ;;  %s3122_s0 = smov 17   ;;  %v3123_v6 = vmov 0.0   ;;  %vm117_vm4 = vcmask 1043456  }
   0xf   :  { %101 = vrot.lane.b32.xlu0 %v99_v5, %s3122_s0  ;;  %s3124_s2 = smov 16   ;;  %s3125_s28 = smov 32   ;;  %v3183_v15 = vld [vmem:[#allocation6] sm:$0xf]  ;;  %vm58_vm5 = vcmask 134144   ;;  %vm61_vm6 = vcmask 273544  }
  0x10   :  { %v65_v1 = vand.u32 127, %v64_v0  ;;  %s3126_s29 = smov 2   ;;  %s3127_s30 = smov 18   ;;  %59 = vst.msk [vmem:[#allocation2] sm:$0xf] %vm58_vm5, %v3123_v6  ;;  %vm108_vm7 = vcmask 1043592  }
  0x11   :  { %s3128_s4 = smov 34   ;;  %s3129_s5 = smov 124   ;;  %62 = vst.msk [vmem:[#allocation2 + $0x8] sm:$0xf] %vm61_vm6, %v3123_v6  ;;  %v335_v16 = vld [vmem:[#allocation6] sm:$0xf] }
  0x12   :  { %v66_v2 = vadd.s32 128, %v65_v1  ;;  %v71_v3 = vand.u32 15, %v65_v1  ;;  %60 = vst.msk [vmem:[#allocation2 + $0xc] sm:$0xf] %vm58_vm5, %v3123_v6  ;;  %s3130_s6 = smov 116   ;;  %s3131_s7 = smov 120  }
  0x13   :  { %63 = vst.msk [vmem:[#allocation2 + $0x14] sm:$0xf] %vm61_vm6, %v3123_v6  ;;  %v255_v17 = vld [vmem:[#allocation6] sm:$0xf]  ;;  %s3132_s8 = smov 112   ;;  %s3133_s9 = smov 104  }
  0x14   :  { %v78_v4 = vand.u32 15, %v66_v2  ;;  %vm91_vm0 = vcmp.ne.s32.totalorder %v71_v3, 0  ;;  %vm95_vm1 = vcmp.ne.s32.totalorder %v71_v3, 15  ;;  %v406_v18 = vld [vmem:[#allocation6] sm:$0xf]  ;;  %s3134_s10 = smov 108  }
  0x15   :  { %v93_v7 = vsel %vm91_vm0, 1.0, %v3123_v6  ;;  %v97_v11 = vsel %vm95_vm1, 1.0, %v3123_v6  ;;  %v566_v19 = vld [vmem:[#allocation6] sm:$0xf]  ;;  %s3135_s11 = smov 100   ;;  %vm109_vm8 = vcmask 1047556  }
  0x16   :  { %vm92_vm2 = vcmp.ne.s32.totalorder %v78_v4, 0  ;;  %vm96_vm3 = vcmp.ne.s32.totalorder %v78_v4, 15  ;;  %v486_v20 = vld [vmem:[#allocation6] sm:$0xf]  ;;  %vm104_vm9 = vcmask 138240   ;;  %vm3195_vm10 = vmor %vm109_vm8, %vm108_vm7  ;;  %vm249_vm11 = vcmask 15360  }
  0x17   :  { %v94_v8 = vsel %vm92_vm2, 1.0, %v3123_v6  ;;  %v98_v9 = vsel %vm96_vm3, 1.0, %v3123_v6  ;;  %v637_v21 = vld [vmem:[#allocation6] sm:$0xf]  ;;  %s3136_s12 = smov 127   ;;  %vm329_vm12 = vcmask 130048  }
  0x18   :  { %v116_v10 = vrot.slane %v94_v8, 4  ;;  %v244_v12 = vrot.slane %v98_v9, 4  ;;  %s3137_s13 = smov 126   ;;  %vm480_vm13 = vcmask 146432   ;;  %s3138_s14 = smov 111   ;;  %vm560_vm14 = vcmask 261120  }
  0x19   :  { %s3139_s15 = smov 110   ;;  %s3140_s16 = smov 96   ;;  %vm711_vm15 = vcmask 277504   ;;  %vm143_vm0 = vcmask 31744   ;;  %vm140_vm1 = vcmask 1039360   ;;  %vm273_vm2 = vcmask 1031168  }
  0x1a   :  { %v3178_v13 = vsel %vm117_vm4, %v93_v7, %v116_v10  ;;  %v245_v14 = vsel %vm117_vm4, %v97_v11, %v244_v12  ;;  %s3141_s17 = smov 95   ;;  %s3142_s18 = smov 94   ;;  %vm353_vm3 = vcmask 916480   ;;  %vm424_vm6 = vcmask 908288  }
  0x1b   :  { %326 = vrot.lane.b32.xlu1 %v3178_v13, %s3124_s2  ;;  %557 = vrot.lane.b32.xlu2 %v3178_v13, %s3125_s28  ;;  %vm584_vm7 = vcmask 785408   ;;  %vm504_vm8 = vcmask 900096   ;;  %s3143_s19 = smov [#allocation9]   ;;  %s2820_s24 = sshll.u32 %s3774_s3, 4  ;;  %s2821_s24 = int_to_ptr.hbm [resolvable:$true] %s2820_s24 }
  0x1c   :  { %246 = vrot.lane.b32.xlu0 %v245_v14, %s3126_s29  ;;  %s2818_s20 = sshll.u32 %s3143_s19, 4  ;;  %s2819_s20 = int_to_ptr.vmem [resolvable:$true] %s2818_s20 }
  0x23   :  { %477 = vrot.lane.b32.xlu1 %v245_v14, %s3127_s30  ;;  %708 = vrot.lane.b32.xlu2 %v245_v14, %s3128_s4 }
  0x24   :  { %124 = vrot.lane.b32.xlu0 %v3183_v15, %s3129_s5 }
  0x2b   :  { %337 = vrot.lane.b32.xlu2 %v335_v16, %s3130_s6  ;;  %257 = vrot.lane.b32.xlu1 %v255_v17, %s3131_s7 }
  0x2c   :  { %408 = vrot.lane.b32.xlu0 %v406_v18, %s3132_s8 }
  0x33   :  { %568 = vrot.lane.b32.xlu2 %v566_v19, %s3133_s9  ;;  %488 = vrot.lane.b32.xlu1 %v486_v20, %s3134_s10 }
  0x34   :  { %639 = vrot.lane.b32.xlu0 %v637_v21, %s3135_s11 }
  0x75   :  { %v558_v58 = vpop.permute.xlu2 %557 }
  0x76   :  { %v3239_v59 = vrot.slane %v558_v58, 4 }
  0x78   :  { %v3251_v3 = vsel %vm560_vm14, %v3239_v59, %v558_v58 }
  0x7d   :  { %v709_v8 = vpop.permute.xlu2 %708 }
  0x7e   :  { %v3258_v10 = vrot.slane %v709_v8, 4 }
  0x80   :  { %v3266_v18 = vsel %vm711_vm15, %v3258_v10, %v709_v8 }
  0x81   :  { %v102_v22 = vpop.permute.xlu0 %101 }
  0x82   :  { %v103_v24 = vrot.slane %v102_v22, 4 }
  0x84   :  { %v105_v25 = vsel %vm104_vm9, %v103_v24, %v102_v22  ;;  %112 = vst.msk [vmem:[#allocation2 + $0x8] sm:$0xf] %vm58_vm5, %v103_v24 }
  0x85   :  { %111 = vst.msk [vmem:[#allocation2] sm:$0xff] %vm3195_vm10, %v105_v25 }
  0x8b   :  { %v122_v28 = vld [vmem:[#allocation2 + $0x8] sm:$0xf] }
  0x8c   :  { %v3203_v26 = vld [vmem:[#allocation2] sm:$0xff]  ;;  %130 = vst [vmem:[#allocation1 + $0x10] ss:$2 sm:$0xff] %v122_v28  ;;  %v241_v30 = vld [vmem:[#allocation2 + $0x8] sm:$0xf] }
  0x8d   :  { %128 = vst [vmem:[#allocation1] ss:$2 sm:$0xff] %v3203_v26  ;;  %v120_v31 = vmul.f32 %v3178_v13, %v3203_v26  ;;  %v327_v36 = vpop.permute.xlu1 %326  ;;  %v325_v39 = vld [vmem:[#allocation2 + $0x8] sm:$0xf]  ;;  %v564_v4 = vmul.f32 %v3251_v3, %v3203_v26  ;;  %v715_v19 = vmul.f32 %v3266_v18, %v3203_v26 }
  0x8e   :  { %v247_v27 = vpop.permute.xlu0 %246  ;;  %v3214_v37 = vrot.slane %v327_v36, 4  ;;  %v405_v46 = vld [vmem:[#allocation2 + $0x8] sm:$0xf] }
  0x8f   :  { %v3206_v29 = vrot.slane %v247_v27, 4  ;;  %v476_v53 = vld [vmem:[#allocation2 + $0x8] sm:$0xf] }
  0x90   :  { %v334_v41 = vmul.f32 %v3214_v37, %v325_v39  ;;  %v3226_v45 = vsel %vm329_vm12, %v3214_v37, %v327_v36  ;;  %v556_v61 = vld [vmem:[#allocation2 + $0x8] sm:$0xf]  ;;  %vm735_vm12 = vcmask 769024  }
  0x91   :  { %v254_v34 = vmul.f32 %v3206_v29, %v241_v30  ;;  %v3217_v38 = vsel %vm249_vm11, %v3206_v29, %v247_v27  ;;  %v333_v47 = vmul.f32 %v3226_v45, %v3203_v26  ;;  %v565_v63 = vmul.f32 %v3239_v59, %v556_v61  ;;  %v636_v5 = vld [vmem:[#allocation2 + $0x8] sm:$0xf]  ;;  %v338_v27 = vpop.permute.xlu2 %337 }
  0x92   :  { %v253_v40 = vmul.f32 %v3217_v38, %v3203_v26  ;;  %v707_v11 = vld [vmem:[#allocation2 + $0x8] sm:$0xf]  ;;  %vm655_vm11 = vcmask 777216  }
  0x93   :  { %v133_v35 = vld.sshfl [vmem:[#allocation1 + $0x10] sm:$0xff pattern:$0x75316420]  ;;  %v716_v12 = vmul.f32 %v3258_v10, %v707_v11 }
  0x94   :  { %v131_v32 = vld.sshfl [vmem:[#allocation1] sm:$0xff pattern:$0x75316420]  ;;  %v132_v33 = vld.sshfl [vmem:[#allocation1 + $0x8] sm:$0xff pattern:$0x75316420]  ;;  %138 = vrot.lane.b32.xlu2 %v133_v35, %s3136_s12 }
  0x95   :  { %191 = vst [vmem:[#allocation1] ss:$2 sm:$0xff] %v120_v31  ;;  %136 = vrot.lane.b32.xlu1 %v132_v33, %s3136_s12  ;;  %134 = vrot.lane.b32.xlu0 %v131_v32, %s3136_s12  ;;  %v478_v51 = vpop.permute.xlu1 %477 }
  0x96   :  { %263 = vst [vmem:[#allocation1 + $0x10] ss:$2 sm:$0xff] %v254_v34  ;;  %v3233_v52 = vrot.slane %v478_v51, 4  ;;  %v125_v28 = vpop.permute.xlu0 %124 }
  0x98   :  { %v485_v56 = vmul.f32 %v3233_v52, %v476_v53  ;;  %v3242_v60 = vsel %vm480_vm13, %v3233_v52, %v478_v51 }
  0x99   :  { %v484_v62 = vmul.f32 %v3242_v60, %v3203_v26  ;;  %v3281_v30 = vpop.permute.xlu2 %568 }
  0x9c   :  { %v192_v42 = vld.sshfl [vmem:[#allocation1] sm:$0xff pattern:$0x75316420]  ;;  %v193_v43 = vld.sshfl [vmem:[#allocation1 + $0x8] sm:$0xff pattern:$0x75316420] }
  0x9d   :  { %261 = vst [vmem:[#allocation1] ss:$2 sm:$0xff] %v253_v40  ;;  %v266_v44 = vld.sshfl [vmem:[#allocation1 + $0x10] sm:$0xff pattern:$0x75316420]  ;;  %2838 = vmatpush.msk.msra.mxu2 %vm117_vm4, %v192_v42  ;;  %2840 = vmatpush.msk.msra.mxu3 %vm117_vm4, %v193_v43  ;;  %v258_v31 = vpop.permute.xlu1 %257 }
  0x9e   :  { %343 = vst [vmem:[#allocation1 + $0x10] ss:$2 sm:$0xff] %v334_v41  ;;  %271 = vrot.lane.b32.xlu0 %v266_v44, %s3137_s13  ;;  %2839 = vmatmul.msk.f32.vlgmr.msra.gmra.mxu2 %vm143_vm0, %v3183_v15  ;;  %v409_v32 = vpop.permute.xlu0 %408 }
  0x9f   :  { %2841 = vmatmul.msk.f32.vlgmr.msra.gmra.mxu3 %vm143_vm0, %v3183_v15 }
  0xa4   :  { %v264_v48 = vld.sshfl [vmem:[#allocation1] sm:$0xff pattern:$0x75316420]  ;;  %v265_v49 = vld.sshfl [vmem:[#allocation1 + $0x8] sm:$0xff pattern:$0x75316420] }
  0xa5   :  { %341 = vst [vmem:[#allocation1] ss:$2 sm:$0xff] %v333_v47  ;;  %v346_v50 = vld.sshfl [vmem:[#allocation1 + $0x10] sm:$0xff pattern:$0x75316420]  ;;  %269 = vrot.lane.b32.xlu2 %v265_v49, %s3137_s13  ;;  %267 = vrot.lane.b32.xlu1 %v264_v48, %s3137_s13  ;;  %v489_v34 = vpop.permute.xlu1 %488 }
  0xa6   :  { %414 = vst [vmem:[#allocation1 + $0x10] ss:$2 sm:$0xff] %v405_v46  ;;  %351 = vrot.lane.b32.xlu0 %v346_v50, %s3132_s8  ;;  %v3283_v35 = vpop.permute.xlu0 %639 }
  0xac   :  { %v344_v54 = vld.sshfl [vmem:[#allocation1] sm:$0xff pattern:$0x75316420]  ;;  %v345_v55 = vld.sshfl [vmem:[#allocation1 + $0x8] sm:$0xff pattern:$0x75316420] }
  0xad   :  { %412 = vst [vmem:[#allocation1] ss:$2 sm:$0xff] %v3203_v26  ;;  %v417_v57 = vld.sshfl [vmem:[#allocation1 + $0x10] sm:$0xff pattern:$0x75316420]  ;;  %347 = vrot.lane.b32.xlu1 %v344_v54, %s3132_s8 }
  0xae   :  { %494 = vst [vmem:[#allocation1 + $0x10] ss:$2 sm:$0xff] %v485_v56  ;;  %422 = vrot.lane.b32.xlu2 %v417_v57, %s3138_s14 }
  0xb4   :  { %v415_v0 = vld.sshfl [vmem:[#allocation1] sm:$0xff pattern:$0x75316420]  ;;  %v416_v1 = vld.sshfl [vmem:[#allocation1 + $0x8] sm:$0xff pattern:$0x75316420] }
  0xb5   :  { %492 = vst [vmem:[#allocation1] ss:$2 sm:$0xff] %v484_v62  ;;  %v497_v2 = vld.sshfl [vmem:[#allocation1 + $0x10] sm:$0xff pattern:$0x75316420]  ;;  %420 = vrot.lane.b32.xlu1 %v416_v1, %s3138_s14  ;;  %418 = vrot.lane.b32.xlu0 %v415_v0, %s3138_s14 }
  0xb6   :  { %574 = vst [vmem:[#allocation1 + $0x10] ss:$2 sm:$0xff] %v565_v63  ;;  %349 = vrot.lane.b32.xlu2 %v345_v55, %s3132_s8 }
  0xbc   :  { %v495_v6 = vld.sshfl [vmem:[#allocation1] sm:$0xff pattern:$0x75316420]  ;;  %v496_v7 = vld.sshfl [vmem:[#allocation1 + $0x8] sm:$0xff pattern:$0x75316420] }
  0xbd   :  { %572 = vst [vmem:[#allocation1] ss:$2 sm:$0xff] %v564_v4  ;;  %v577_v9 = vld.sshfl [vmem:[#allocation1 + $0x10] sm:$0xff pattern:$0x75316420]  ;;  %498 = vrot.lane.b32.xlu0 %v495_v6, %s3139_s15 }
  0xbe   :  { %645 = vst [vmem:[#allocation1 + $0x10] ss:$2 sm:$0xff] %v636_v5  ;;  %502 = vrot.lane.b32.xlu2 %v497_v2, %s3139_s15  ;;  %582 = vrot.lane.b32.xlu1 %v577_v9, %s3140_s16 }
  0xc4   :  { %v575_v14 = vld.sshfl [vmem:[#allocation1] sm:$0xff pattern:$0x75316420]  ;;  %v576_v16 = vld.sshfl [vmem:[#allocation1 + $0x8] sm:$0xff pattern:$0x75316420] }
  0xc5   :  { %643 = vst [vmem:[#allocation1] ss:$2 sm:$0xff] %v3203_v26  ;;  %v648_v17 = vld.sshfl [vmem:[#allocation1 + $0x10] sm:$0xff pattern:$0x75316420]  ;;  %580 = vrot.lane.b32.xlu0 %v576_v16, %s3140_s16 }
  0xc6   :  { %725 = vst [vmem:[#allocation1 + $0x10] ss:$2 sm:$0xff] %v716_v12  ;;  %500 = vrot.lane.b32.xlu1 %v496_v7, %s3139_s15  ;;  %578 = vrot.lane.b32.xlu2 %v575_v14, %s3140_s16  ;;  %v717_v26 = vld [vmem:[#allocation6] sm:$0xf] }
  0xcc   :  { %v647_v20 = vld.sshfl [vmem:[#allocation1 + $0x8] sm:$0xff pattern:$0x75316420]  ;;  %v646_v21 = vld.sshfl [vmem:[#allocation1] sm:$0xff pattern:$0x75316420] }
  0xcd   :  { %651 = vrot.lane.b32.xlu0 %v647_v20, %s3141_s17  ;;  %723 = vst [vmem:[#allocation1] ss:$2 sm:$0xff] %v715_v19  ;;  %v728_v22 = vld.sshfl [vmem:[#allocation1 + $0x10] sm:$0xff pattern:$0x75316420] }
  0xce   :  { %653 = vrot.lane.b32.xlu1 %v648_v17, %s3141_s17  ;;  %649 = vrot.lane.b32.xlu2 %v646_v21, %s3141_s17 }
  0xd4   :  { %v727_v24 = vld.sshfl [vmem:[#allocation1 + $0x8] sm:$0xff pattern:$0x75316420]  ;;  %v726_v25 = vld.sshfl [vmem:[#allocation1] sm:$0xff pattern:$0x75316420] }
  0xd5   :  { %733 = vrot.lane.b32.xlu0 %v728_v22, %s3142_s18 }
  0xd6   :  { %731 = vrot.lane.b32.xlu2 %v727_v24, %s3142_s18  ;;  %729 = vrot.lane.b32.xlu1 %v726_v25, %s3142_s18 }
  0xde   :  { %719 = vrot.lane.b32.xlu1 %v717_v26, %s3140_s16 }
  0xee   :  { %v139_v33 = vpop.permute.xlu2 %138 }
  0xff   :  { %v270_v36 = vpop.permute.xlu2 %269 }
 0x107   :  { %v137_v39 = vpop.permute.xlu1 %136  ;;  %v135_v40 = vpop.permute.xlu0 %134 }
 0x108   :  { %v141_v41 = vsel %vm140_vm1, %v135_v40, %v137_v39  ;;  %v142_v42 = vsel %vm140_vm1, %v137_v39, %v139_v33  ;;  %v423_v15 = vpop.permute.xlu2 %422 }
 0x109   :  { %2834 = vmatpush.msk.msra.mxu0 %vm117_vm4, %v141_v41  ;;  %2836 = vmatpush.msk.msra.mxu1 %vm117_vm4, %v142_v42 }
 0x10a   :  { %2835 = vmatmul.msk.f32.vlgmr.msra.gmra.mxu0 %vm143_vm0, %v125_v28  ;;  %2837 = vmatmul.msk.f32.vlgmr.msra.gmra.mxu1 %vm143_vm0, %v125_v28 }
 0x110   :  { %v272_v43 = vpop.permute.xlu0 %271  ;;  %v350_v47 = vpop.permute.xlu2 %349 }
 0x111   :  { %v275_v44 = vsel %vm273_vm2, %v270_v36, %v272_v43 }
 0x112   :  { %2844 = vmatpush.msk.msrb.mxu1 %vm117_vm4, %v275_v44 }
 0x113   :  { %2845 = vmatmul.msk.f32.vlgmr.msrb.gmra.mxu1 %vm143_vm0, %v258_v31 }
 0x117   :  { %v268_v46 = vpop.permute.xlu1 %267 }
 0x118   :  { %v352_v48 = vpop.permute.xlu0 %351  ;;  %v274_v49 = vsel %vm273_vm2, %v268_v46, %v270_v36  ;;  %v503_v58 = vpop.permute.xlu2 %502 }
 0x119   :  { %2842 = vmatpush.msk.msrb.mxu0 %vm117_vm4, %v274_v49  ;;  %v355_v50 = vsel %vm353_vm3, %v350_v47, %v352_v48 }
 0x11a   :  { %2848 = vmatpush.msk.msrb.mxu3 %vm117_vm4, %v355_v50  ;;  %2843 = vmatmul.msk.f32.vlgmr.msrb.gmra.mxu0 %vm143_vm0, %v258_v31 }
 0x11b   :  { %2849 = vmatmul.msk.f32.vlgmr.msrb.gmra.mxu3 %vm143_vm0, %v338_v27 }
 0x11f   :  { %v348_v51 = vpop.permute.xlu1 %347 }
 0x120   :  { %v354_v53 = vsel %vm353_vm3, %v348_v51, %v350_v47  ;;  %v579_v63 = vpop.permute.xlu2 %578 }
 0x121   :  { %2846 = vmatpush.msk.msrb.mxu2 %vm117_vm4, %v354_v53  ;;  %v217_v25 = vpop.f32.mrf.mxu2 }
 0x122   :  { %2847 = vmatmul.msk.f32.vlgmr.msrb.gmra.mxu2 %vm143_vm0, %v338_v27  ;;  %v237_v26 = vpop.f32.mrf.mxu3 }
 0x127   :  { %v421_v54 = vpop.permute.xlu1 %420  ;;  %v419_v55 = vpop.permute.xlu0 %418 }
 0x128   :  { %v426_v56 = vsel %vm424_vm6, %v421_v54, %v423_v15  ;;  %v425_v57 = vsel %vm424_vm6, %v419_v55, %v421_v54  ;;  %v650_v7 = vpop.permute.xlu2 %649 }
 0x129   :  { %2850 = vmatpush.msk.msra.mxu0 %vm117_vm4, %v425_v57  ;;  %2852 = vmatpush.msk.msra.mxu1 %vm117_vm4, %v426_v56 }
 0x12a   :  { %2851 = vmatmul.msk.f32.vlgmr.msra.gmra.mxu0 %vm143_vm0, %v409_v32  ;;  %2853 = vmatmul.msk.f32.vlgmr.msra.gmra.mxu1 %vm143_vm0, %v409_v32 }
 0x12f   :  { %v499_v61 = vpop.permute.xlu0 %498 }
 0x130   :  { %v583_v62 = vpop.permute.xlu1 %582  ;;  %v732_v14 = vpop.permute.xlu2 %731 }
 0x137   :  { %v581_v0 = vpop.permute.xlu0 %580 }
 0x138   :  { %v501_v1 = vpop.permute.xlu1 %500  ;;  %v585_v2 = vsel %vm584_vm7, %v579_v63, %v581_v0  ;;  %v586_v4 = vsel %vm584_vm7, %v581_v0, %v583_v62 }
 0x139   :  { %v505_v5 = vsel %vm504_vm8, %v499_v61, %v501_v1  ;;  %v506_v6 = vsel %vm504_vm8, %v501_v1, %v503_v58  ;;  %2858 = vmatpush.msk.msrb.mxu0 %vm117_vm4, %v585_v2  ;;  %2860 = vmatpush.msk.msrb.mxu1 %vm117_vm4, %v586_v4 }
 0x13a   :  { %2854 = vmatpush.msk.msra.mxu2 %vm117_vm4, %v505_v5  ;;  %2856 = vmatpush.msk.msra.mxu3 %vm117_vm4, %v506_v6 }
 0x13b   :  { %2855 = vmatmul.msk.f32.vlgmr.msra.gmra.mxu2 %vm143_vm0, %v489_v34  ;;  %2857 = vmatmul.msk.f32.vlgmr.msra.gmra.mxu3 %vm143_vm0, %v489_v34 }
 0x13c   :  { %2859 = vmatmul.msk.f32.vlgmr.msrb.gmra.mxu0 %vm143_vm0, %v3281_v30  ;;  %2861 = vmatmul.msk.f32.vlgmr.msrb.gmra.mxu1 %vm143_vm0, %v3281_v30 }
 0x13f   :  { %v652_v8 = vpop.permute.xlu0 %651 }
 0x140   :  { %v654_v9 = vpop.permute.xlu1 %653  ;;  %v656_v11 = vsel %vm655_vm11, %v650_v7, %v652_v8 }
 0x141   :  { %v657_v12 = vsel %vm655_vm11, %v652_v8, %v654_v9  ;;  %2862 = vmatpush.msk.msrb.mxu2 %vm117_vm4, %v656_v11 }
 0x142   :  { %2864 = vmatpush.msk.msrb.mxu3 %vm117_vm4, %v657_v12 }
 0x143   :  { %2863 = vmatmul.msk.f32.vlgmr.msrb.gmra.mxu2 %vm143_vm0, %v3283_v35  ;;  %2865 = vmatmul.msk.f32.vlgmr.msrb.gmra.mxu3 %vm143_vm0, %v3283_v35 }
 0x147   :  { %v734_v16 = vpop.permute.xlu0 %733 }
 0x148   :  { %v737_v17 = vsel %vm735_vm12, %v732_v14, %v734_v16  ;;  %v730_v19 = vpop.permute.xlu1 %729 }
 0x149   :  { %v736_v20 = vsel %vm735_vm12, %v730_v19, %v732_v14  ;;  %2868 = vmatpush.msk.msra.mxu1 %vm117_vm4, %v737_v17 }
 0x14a   :  { %2866 = vmatpush.msk.msra.mxu0 %vm117_vm4, %v736_v20 }
 0x150   :  { %v720_v21 = vpop.permute.xlu1 %719 }
 0x151   :  { %2867 = vmatmul.msk.f32.vlgmr.msra.gmra.mxu0 %vm143_vm0, %v720_v21  ;;  %2869 = vmatmul.msk.f32.vlgmr.msra.gmra.mxu1 %vm143_vm0, %v720_v21 }
 0x187   :  { %v187_v22 = vpop.f32.mrf.mxu1  ;;  %v167_v24 = vpop.f32.mrf.mxu0 }
 0x188   :  { %v218_v32 = vadd.f32 %v217_v25, %v167_v24  ;;  %v238_v35 = vadd.f32 %v237_v26, %v187_v22 }
 0x190   :  { %v319_v27 = vpop.f32.mrf.mxu1 }
 0x191   :  { %v323_v41 = vadd.f32 %v319_v27, %v238_v35  ;;  %v952_v35 = vld [vmem:[#allocation8] sm:$0xf] }
 0x197   :  { %v299_v28 = vpop.f32.mrf.mxu0 }
 0x198   :  { %v322_v36 = vadd.f32 %v299_v28, %v218_v32 }
 0x19e   :  { %v399_v30 = vpop.f32.mrf.mxu3 }
 0x19f   :  { %v403_v15 = vadd.f32 %v399_v30, %v323_v41  ;;  %v1094_v41 = vld [vmem:[#allocation8] sm:$0xf] }
 0x1a5   :  { %v379_v31 = vpop.f32.mrf.mxu2 }
 0x1a6   :  { %v402_v42 = vadd.f32 %v379_v31, %v322_v36  ;;  %v1166_v36 = vld [vmem:[#allocation8] sm:$0xf] }
 0x1a7   :  { %v450_v33 = vpop.f32.mrf.mxu0  ;;  %v470_v34 = vpop.f32.mrf.mxu1 }
 0x1a8   :  { %v473_v43 = vadd.f32 %v450_v33, %v402_v42  ;;  %v474_v44 = vadd.f32 %v470_v34, %v403_v15  ;;  %v1485_v34 = vld [vmem:[#allocation3 + $0x8] sm:$0xff]  ;;  %v1691_v42 = vld [vmem:[#allocation6] sm:$0xf]  ;;  %v1024_v15 = vld [vmem:[#allocation8] sm:$0xf] }
 0x1b9   :  { %v610_v46 = vpop.f32.mrf.mxu0  ;;  %v630_v47 = vpop.f32.mrf.mxu1 }
 0x1be   :  { %v530_v39 = vpop.f32.mrf.mxu2  ;;  %v550_v40 = vpop.f32.mrf.mxu3 }
 0x1bf   :  { %v553_v48 = vadd.f32 %v530_v39, %v473_v43  ;;  %v554_v49 = vadd.f32 %v550_v40, %v474_v44  ;;  %v1380_v39 = vld [vmem:[#allocation8] sm:$0xf] }
 0x1c0   :  { %v831_v40 = vld [vmem:[#allocation8] sm:$0xf] }
 0x1c1   :  { %v633_v53 = vadd.f32 %v610_v46, %v553_v48  ;;  %v634_v54 = vadd.f32 %v630_v47, %v554_v49  ;;  %v1308_v43 = vld [vmem:[#allocation8] sm:$0xf]  ;;  %v1619_v46 = vld [vmem:[#allocation6] sm:$0xf] }
 0x1c2   :  { %v1238_v44 = vld [vmem:[#allocation8] sm:$0xf]  ;;  %v3354_v47 = vld [vmem:[#allocation6] sm:$0xf] }
 0x1c3   :  { %v1833_v48 = vld [vmem:[#allocation6] sm:$0xf] }
 0x1c6   :  { %v681_v50 = vpop.f32.mrf.mxu2  ;;  %v701_v51 = vpop.f32.mrf.mxu3 }
 0x1c7   :  { %v704_v55 = vadd.f32 %v681_v50, %v633_v53  ;;  %v705_v56 = vadd.f32 %v701_v51, %v634_v54  ;;  %v1761_v53 = vld [vmem:[#allocation6] sm:$0xf] }
 0x1ce   :  { %v761_v57 = vpop.f32.mrf.mxu0  ;;  %v781_v58 = vpop.f32.mrf.mxu1 }
 0x1cf   :  { %v784_v61 = vadd.f32 %v761_v57, %v704_v55  ;;  %v785_v62 = vadd.f32 %v781_v58, %v705_v56 }
 0x1d1   :  { %v786_v63 = vsel %vm117_vm4, %v784_v61, 0.0  ;;  %v787_v0 = vsel %vm117_vm4, %v785_v62, 0.0 }
 0x1d2   :  { %v788_v1 = vadd.f32 %v787_v0, %v786_v63 }
 0x1d4   :  { %789 = vadd.xlane.f32.xlu2 %v788_v1 }
 0x1ec   :  { %834 = vrot.lane.b32.xlu2 %v831_v40, %s3129_s5 }
 0x1f4   :  { %1026 = vrot.lane.b32.xlu2 %v1024_v15, %s3130_s6 }
 0x1fc   :  { %1240 = vrot.lane.b32.xlu2 %v1238_v44, %s3133_s9 }
 0x204   :  { %1501 = vrot.lane.b32.xlu2 %v3354_v47, %s3129_s5 }
 0x20c   :  { %1763 = vrot.lane.b32.xlu2 %v1761_v53, %s3132_s8 }
 0x247   :  { %v790_v2 = vpop.xlane.xlu2 %789 }
 0x248   :  { %v791_v4 = vmul.f32 0.00390625, %v790_v2 }
 0x24a   :  { %v792_v5 = vsub.f32 %v784_v61, %v791_v4  ;;  %v793_v6 = vsub.f32 %v785_v62, %v791_v4 }
 0x24c   :  { %v794_v7 = vmul.f32 %v792_v5, %v792_v5  ;;  %v795_v8 = vmul.f32 %v793_v6, %v793_v6 }
 0x24e   :  { %v796_v9 = vsel %vm117_vm4, %v794_v7, 0.0  ;;  %v797_v11 = vsel %vm117_vm4, %v795_v8, 0.0 }
 0x24f   :  { %v798_v12 = vadd.f32 %v797_v11, %v796_v9 }
 0x251   :  { %799 = vadd.xlane.f32.xlu0 %v798_v12 }
 0x265   :  { %1096 = vrot.lane.b32.xlu0 %v1094_v41, %s3132_s8 }
 0x26d   :  { %1310 = vrot.lane.b32.xlu0 %v1308_v43, %s3135_s11 }
 0x275   :  { %1621 = vrot.lane.b32.xlu0 %v1619_v46, %s3131_s7 }
 0x27d   :  { %1835 = vrot.lane.b32.xlu0 %v1833_v48, %s3134_s10 }
 0x2c4   :  { %v800_v14 = vpop.xlane.xlu0 %799 }
 0x2c5   :  { %v801_v16 = vmul.f32 0.00390625, %v800_v14 }
 0x2c7   :  { %v802_v17 = vadd.f32 1e-05, %v801_v16 }
 0x2c9   :  { %3005 = vrsqrt.f32 %v802_v17  ;;  %vm809_vm14 = vweird.f32 %v802_v17 }
 0x2cf   :  { %v3006_v19 = vpop.eup %3005 }
 0x2d0   :  { %v804_v20 = vmul.f32 %v3006_v19, %v802_v17  ;;  %vm810_vm13 = vweird.f32 %v3006_v19 }
 0x2d1   :  { %vm811_vm15 = vmor %vm809_vm14, %vm810_vm13 }
 0x2d2   :  { %v805_v21 = vmul.f32 %v3006_v19, %v804_v20 }
 0x2d4   :  { %v806_v22 = vmul.f32 0.5, %v805_v21 }
 0x2d6   :  { %v807_v24 = vsub.f32 1.5, %v806_v22 }
 0x2d8   :  { %v808_v25 = vmul.f32 %v3006_v19, %v807_v24 }
 0x2da   :  { %v812_v26 = vsel %vm811_vm15, %v3006_v19, %v808_v25 }
 0x2db   :  { %v813_v27 = vmul.f32 %v812_v26, %v792_v5  ;;  %v814_v28 = vmul.f32 %v812_v26, %v793_v6 }
 0x2dd   :  { %v816_v30 = vmax.f32 %v814_v28, 0.0  ;;  %v815_v31 = vmax.f32 %v813_v27, 0.0 }
 0x2df   :  { %v819_v32 = vrot.slane %v816_v30, 4 }
 0x2e1   :  { %v820_v33 = vsel %vm117_vm4, %v815_v31, %v819_v32 }
 0x2e2   :  { %821 = vrot.lane.b32.xlu1 %v820_v33, %s3122_s0 }
 0x2ea   :  { %1487 = vrot.lane.b32.xlu1 %v1485_v34, %s3122_s0 }
 0x2f2   :  { %954 = vrot.lane.b32.xlu1 %v952_v35, %s3131_s7 }
 0x2fa   :  { %1168 = vrot.lane.b32.xlu1 %v1166_v36, %s3134_s10 }
 0x302   :  { %1382 = vrot.lane.b32.xlu1 %v1380_v39, %s3140_s16 }
 0x30a   :  { %1693 = vrot.lane.b32.xlu1 %v1691_v42, %s3130_s6 }
 0x354   :  { %v822_v49 = vpop.permute.xlu1 %821 }
 0x355   :  { %v823_v50 = vrot.slane %v822_v49, 4 }
 0x357   :  { %v824_v51 = vsel %vm104_vm9, %v823_v50, %v822_v49  ;;  %828 = vst.msk [vmem:[#allocation2 + $0x8] sm:$0xf] %vm58_vm5, %v823_v50 }
 0x358   :  { %827 = vst.msk [vmem:[#allocation2] sm:$0xff] %vm3195_vm10, %v824_v51 }
 0x35c   :  { %v1488_v54 = vpop.permute.xlu1 %1487 }
 0x35d   :  { %v1489_v55 = vrot.slane %v1488_v54, 4 }
 0x35e   :  { %v832_v56 = vld [vmem:[#allocation2 + $0x8] sm:$0xf] }
 0x35f   :  { %v3364_v57 = vld [vmem:[#allocation2] sm:$0xff]  ;;  %840 = vst [vmem:[#allocation1 + $0x10] ss:$2 sm:$0xff] %v832_v56  ;;  %v1490_v58 = vsel %vm104_vm9, %v1489_v55, %v1488_v54  ;;  %v949_v61 = vld [vmem:[#allocation2 + $0x8] sm:$0xf]  ;;  %v3418_v56 = vpop.permute.xlu2 %834 }
 0x360   :  { %838 = vst [vmem:[#allocation1] ss:$2 sm:$0xff] %v3364_v57  ;;  %v830_v62 = vmul.f32 %v3364_v57, %v3178_v13  ;;  %v951_v2 = vmul.f32 %v949_v61, %v3206_v29  ;;  %v1021_v4 = vld [vmem:[#allocation2 + $0x8] sm:$0xf]  ;;  %v950_v5 = vmul.f32 %v3364_v57, %v3217_v38  ;;  %v1022_v11 = vmul.f32 %v3364_v57, %v3226_v45 }
 0x361   :  { %1494 = vst.msk [vmem:[#allocation2 + $0xc] sm:$0xff] %vm3195_vm10, %v1490_v58  ;;  %v1023_v8 = vmul.f32 %v1021_v4, %v3214_v37  ;;  %v1093_v16 = vld [vmem:[#allocation2 + $0x8] sm:$0xf]  ;;  %v1164_v26 = vmul.f32 %v3364_v57, %v3242_v60  ;;  %v1236_v32 = vmul.f32 %v3364_v57, %v3251_v3  ;;  %v1378_v43 = vmul.f32 %v3364_v57, %v3266_v18 }
 0x362   :  { %1495 = vst.msk [vmem:[#allocation2 + $0x14] sm:$0xf] %vm58_vm5, %v1489_v55  ;;  %v1163_v19 = vld [vmem:[#allocation2 + $0x8] sm:$0xf] }
 0x363   :  { %v1165_v22 = vmul.f32 %v1163_v19, %v3233_v52  ;;  %v1235_v25 = vld [vmem:[#allocation2 + $0x8] sm:$0xf] }
 0x364   :  { %v1237_v30 = vmul.f32 %v1235_v25, %v3239_v59  ;;  %v1307_v35 = vld [vmem:[#allocation2 + $0x8] sm:$0xf] }
 0x365   :  { %v1377_v39 = vld [vmem:[#allocation2 + $0x8] sm:$0xf] }
 0x366   :  { %v843_v63 = vld.sshfl [vmem:[#allocation1 + $0x10] sm:$0xff pattern:$0x75316420]  ;;  %v1379_v42 = vmul.f32 %v1377_v39, %v3258_v10 }
 0x367   :  { %v842_v0 = vld.sshfl [vmem:[#allocation1 + $0x8] sm:$0xff pattern:$0x75316420]  ;;  %v841_v1 = vld.sshfl [vmem:[#allocation1] sm:$0xff pattern:$0x75316420]  ;;  %848 = vrot.lane.b32.xlu1 %v843_v63, %s3136_s12  ;;  %v3430_v4 = vpop.permute.xlu2 %1026 }
 0x368   :  { %899 = vst [vmem:[#allocation1] ss:$2 sm:$0xff] %v830_v62  ;;  %v3413_v51 = vld [vmem:[#allocation2 + $0xc] sm:$0xff] }
 0x369   :  { %960 = vst [vmem:[#allocation1 + $0x10] ss:$2 sm:$0xff] %v951_v2  ;;  %v1499_v44 = vld [vmem:[#allocation2 + $0x14] sm:$0xf]  ;;  %v1497_v61 = vmul.f32 %v3413_v51, %v3178_v13  ;;  %v3426_v2 = vpop.permute.xlu1 %954 }
 0x36a   :  { %v1616_v50 = vld [vmem:[#allocation2 + $0x14] sm:$0xf] }
 0x36b   :  { %v1618_v55 = vmul.f32 %v1616_v50, %v3206_v29  ;;  %v1688_v58 = vld [vmem:[#allocation2 + $0x14] sm:$0xf] }
 0x36f   :  { %v900_v6 = vld.sshfl [vmem:[#allocation1] sm:$0xff pattern:$0x75316420]  ;;  %v901_v7 = vld.sshfl [vmem:[#allocation1 + $0x8] sm:$0xff pattern:$0x75316420]  ;;  %844 = vrot.lane.b32.xlu1 %v841_v1, %s3136_s12 }
 0x370   :  { %958 = vst [vmem:[#allocation1] ss:$2 sm:$0xff] %v950_v5  ;;  %2874 = vmatpush.msk.msrb.mxu0 %vm117_vm4, %v900_v6  ;;  %2876 = vmatpush.msk.msrb.mxu1 %vm117_vm4, %v901_v7  ;;  %v963_v9 = vld.sshfl [vmem:[#allocation1 + $0x10] sm:$0xff pattern:$0x75316420]  ;;  %v1617_v5 = vmul.f32 %v3413_v51, %v3217_v38 }
 0x371   :  { %2875 = vmatmul.msk.f32.vlgmr.msrb.gmra.mxu0 %vm143_vm0, %v831_v40  ;;  %2877 = vmatmul.msk.f32.vlgmr.msrb.gmra.mxu1 %vm143_vm0, %v831_v40  ;;  %1032 = vst [vmem:[#allocation1 + $0x10] ss:$2 sm:$0xff] %v1023_v8  ;;  %v1760_v8 = vld [vmem:[#allocation2 + $0x14] sm:$0xf] }
 0x377   :  { %v961_v12 = vld.sshfl [vmem:[#allocation1] sm:$0xff pattern:$0x75316420]  ;;  %v962_v14 = vld.sshfl [vmem:[#allocation1 + $0x8] sm:$0xff pattern:$0x75316420]  ;;  %846 = vrot.lane.b32.xlu1 %v842_v0, %s3136_s12  ;;  %v1690_v0 = vmul.f32 %v1688_v58, %v3214_v37 }
 0x378   :  { %1030 = vst [vmem:[#allocation1] ss:$2 sm:$0xff] %v1022_v11  ;;  %966 = vrot.lane.b32.xlu0 %v962_v14, %s3137_s13  ;;  %v1035_v17 = vld.sshfl [vmem:[#allocation1 + $0x10] sm:$0xff pattern:$0x75316420]  ;;  %v3440_v11 = vpop.permute.xlu1 %1168 }
 0x379   :  { %1102 = vst [vmem:[#allocation1 + $0x10] ss:$2 sm:$0xff] %v1093_v16  ;;  %v1830_v14 = vld [vmem:[#allocation2 + $0x14] sm:$0xf]  ;;  %v1689_v16 = vmul.f32 %v3413_v51, %v3226_v45 }
 0x37f   :  { %v1033_v20 = vld.sshfl [vmem:[#allocation1] sm:$0xff pattern:$0x75316420]  ;;  %v1034_v21 = vld.sshfl [vmem:[#allocation1 + $0x8] sm:$0xff pattern:$0x75316420]  ;;  %968 = vrot.lane.b32.xlu1 %v963_v9, %s3137_s13 }
 0x380   :  { %1100 = vst [vmem:[#allocation1] ss:$2 sm:$0xff] %v3364_v57  ;;  %1038 = vrot.lane.b32.xlu0 %v1034_v21, %s3132_s8  ;;  %1036 = vrot.lane.b32.xlu2 %v1033_v20, %s3132_s8  ;;  %v1105_v24 = vld.sshfl [vmem:[#allocation1 + $0x10] sm:$0xff pattern:$0x75316420]  ;;  %v1832_v20 = vmul.f32 %v1830_v14, %v3233_v52  ;;  %v3452_v25 = vpop.permute.xlu1 %1382 }
 0x381   :  { %1174 = vst [vmem:[#allocation1 + $0x10] ss:$2 sm:$0xff] %v1165_v22  ;;  %v3450_v22 = vpop.permute.xlu0 %1096 }
 0x387   :  { %v1103_v27 = vld.sshfl [vmem:[#allocation1] sm:$0xff pattern:$0x75316420]  ;;  %v1104_v28 = vld.sshfl [vmem:[#allocation1 + $0x8] sm:$0xff pattern:$0x75316420]  ;;  %1040 = vrot.lane.b32.xlu1 %v1035_v17, %s3132_s8 }
 0x388   :  { %1172 = vst [vmem:[#allocation1] ss:$2 sm:$0xff] %v1164_v26  ;;  %1106 = vrot.lane.b32.xlu2 %v1103_v27, %s3138_s14  ;;  %v1177_v31 = vld.sshfl [vmem:[#allocation1 + $0x10] sm:$0xff pattern:$0x75316420] }
 0x389   :  { %1182 = vrot.lane.b32.xlu0 %v1177_v31, %s3139_s15  ;;  %1246 = vst [vmem:[#allocation1 + $0x10] ss:$2 sm:$0xff] %v1237_v30 }
 0x38f   :  { %v1175_v33 = vld.sshfl [vmem:[#allocation1] sm:$0xff pattern:$0x75316420]  ;;  %v1176_v34 = vld.sshfl [vmem:[#allocation1 + $0x8] sm:$0xff pattern:$0x75316420]  ;;  %964 = vrot.lane.b32.xlu1 %v961_v12, %s3137_s13  ;;  %v3442_v12 = vpop.permute.xlu2 %1240 }
 0x390   :  { %1244 = vst [vmem:[#allocation1] ss:$2 sm:$0xff] %v1236_v32  ;;  %1180 = vrot.lane.b32.xlu2 %v1176_v34, %s3139_s15  ;;  %v1249_v36 = vld.sshfl [vmem:[#allocation1 + $0x10] sm:$0xff pattern:$0x75316420]  ;;  %v3460_v32 = vpop.permute.xlu0 %1310 }
 0x391   :  { %1108 = vrot.lane.b32.xlu0 %v1104_v28, %s3138_s14  ;;  %1316 = vst [vmem:[#allocation1 + $0x10] ss:$2 sm:$0xff] %v1307_v35 }
 0x397   :  { %v1247_v40 = vld.sshfl [vmem:[#allocation1] sm:$0xff pattern:$0x75316420]  ;;  %v1248_v41 = vld.sshfl [vmem:[#allocation1 + $0x8] sm:$0xff pattern:$0x75316420]  ;;  %1110 = vrot.lane.b32.xlu1 %v1105_v24, %s3138_s14  ;;  %v3454_v26 = vpop.permute.xlu2 %1501 }
 0x398   :  { %1314 = vst [vmem:[#allocation1] ss:$2 sm:$0xff] %v3364_v57  ;;  %v1319_v15 = vld.sshfl [vmem:[#allocation1 + $0x10] sm:$0xff pattern:$0x75316420] }
 0x399   :  { %1254 = vrot.lane.b32.xlu0 %v1249_v36, %s3140_s16  ;;  %1324 = vrot.lane.b32.xlu2 %v1319_v15, %s3141_s17  ;;  %1388 = vst [vmem:[#allocation1 + $0x10] ss:$2 sm:$0xff] %v1379_v42  ;;  %v1902_v24 = vld [vmem:[#allocation2 + $0x14] sm:$0xf]  ;;  %v3465_v36 = vpop.permute.xlu1 %1693  ;;  %v1903_v15 = vmul.f32 %v3413_v51, %v3251_v3 }
 0x39a   :  { %v1904_v30 = vmul.f32 %v1902_v24, %v3239_v59  ;;  %v2044_v42 = vld [vmem:[#allocation2 + $0x14] sm:$0xf] }
 0x39f   :  { %v1317_v46 = vld.sshfl [vmem:[#allocation1] sm:$0xff pattern:$0x75316420]  ;;  %v1318_v48 = vld.sshfl [vmem:[#allocation1 + $0x8] sm:$0xff pattern:$0x75316420]  ;;  %1178 = vrot.lane.b32.xlu1 %v1175_v33, %s3139_s15  ;;  %v1831_v33 = vmul.f32 %v3413_v51, %v3242_v60  ;;  %v3468_v39 = vpop.permute.xlu2 %1763 }
 0x3a0   :  { %1386 = vst [vmem:[#allocation1] ss:$2 sm:$0xff] %v1378_v43  ;;  %v1391_v49 = vld.sshfl [vmem:[#allocation1 + $0x10] sm:$0xff pattern:$0x75316420]  ;;  %v3473_v43 = vpop.permute.xlu0 %1621 }
 0x3a1   :  { %1252 = vrot.lane.b32.xlu2 %v1248_v41, %s3140_s16  ;;  %1320 = vrot.lane.b32.xlu0 %v1317_v46, %s3141_s17  ;;  %1507 = vst [vmem:[#allocation1 + $0x10] ss:$2 sm:$0xff] %v1499_v44 }
 0x3a7   :  { %v1389_v53 = vld.sshfl [vmem:[#allocation1] sm:$0xff pattern:$0x75316420]  ;;  %v1390_v54 = vld.sshfl [vmem:[#allocation1 + $0x8] sm:$0xff pattern:$0x75316420]  ;;  %1250 = vrot.lane.b32.xlu1 %v1247_v40, %s3140_s16 }
 0x3a8   :  { %1505 = vst [vmem:[#allocation1] ss:$2 sm:$0xff] %v3413_v51  ;;  %v1510_v57 = vld.sshfl [vmem:[#allocation1 + $0x10] sm:$0xff pattern:$0x75316420]  ;;  %v3482_v58 = vpop.permute.xlu0 %1835 }
 0x3a9   :  { %1396 = vrot.lane.b32.xlu2 %v1391_v49, %s3142_s18  ;;  %1392 = vrot.lane.b32.xlu0 %v1389_v53, %s3142_s18  ;;  %1627 = vst [vmem:[#allocation1 + $0x10] ss:$2 sm:$0xff] %v1618_v55  ;;  %v1974_v40 = vld [vmem:[#allocation2 + $0x14] sm:$0xf] }
 0x3af   :  { %v1508_v62 = vld.sshfl [vmem:[#allocation1] sm:$0xff pattern:$0x75316420]  ;;  %v1509_v63 = vld.sshfl [vmem:[#allocation1 + $0x8] sm:$0xff pattern:$0x75316420]  ;;  %1322 = vrot.lane.b32.xlu1 %v1318_v48, %s3141_s17  ;;  %v2046_v48 = vmul.f32 %v2044_v42, %v3258_v10 }
 0x3b0   :  { %1566 = vst [vmem:[#allocation1] ss:$2 sm:$0xff] %v1497_v61  ;;  %v1630_v1 = vld.sshfl [vmem:[#allocation1 + $0x10] sm:$0xff pattern:$0x75316420] }
 0x3b1   :  { %1635 = vrot.lane.b32.xlu2 %v1630_v1, %s3137_s13  ;;  %1699 = vst [vmem:[#allocation1 + $0x10] ss:$2 sm:$0xff] %v1690_v0  ;;  %1513 = vrot.lane.b32.xlu0 %v1509_v63, %s3136_s12  ;;  %v1905_v63 = vld [vmem:[#allocation6] sm:$0xf]  ;;  %v2045_v0 = vmul.f32 %v3413_v51, %v3266_v18 }
 0x3b7   :  { %v3434_v6 = vld.sshfl [vmem:[#allocation1] sm:$0xff pattern:$0x75316420]  ;;  %v3436_v7 = vld.sshfl [vmem:[#allocation1 + $0x8] sm:$0xff pattern:$0x75316420]  ;;  %1515 = vrot.lane.b32.xlu1 %v1510_v57, %s3136_s12 }
 0x3b8   :  { %1625 = vst [vmem:[#allocation1] ss:$2 sm:$0xff] %v1617_v5  ;;  %v1702_v9 = vld.sshfl [vmem:[#allocation1 + $0x10] sm:$0xff pattern:$0x75316420] }
 0x3b9   :  { %1511 = vrot.lane.b32.xlu2 %v1508_v62, %s3136_s12  ;;  %1769 = vst [vmem:[#allocation1 + $0x10] ss:$2 sm:$0xff] %v1760_v8 }
 0x3bf   :  { %v1628_v17 = vld.sshfl [vmem:[#allocation1] sm:$0xff pattern:$0x75316420]  ;;  %v1629_v19 = vld.sshfl [vmem:[#allocation1 + $0x8] sm:$0xff pattern:$0x75316420]  ;;  %1394 = vrot.lane.b32.xlu1 %v1390_v54, %s3142_s18 }
 0x3c0   :  { %1697 = vst [vmem:[#allocation1] ss:$2 sm:$0xff] %v1689_v16  ;;  %1631 = vrot.lane.b32.xlu0 %v1628_v17, %s3137_s13  ;;  %v1772_v21 = vld.sshfl [vmem:[#allocation1 + $0x10] sm:$0xff pattern:$0x75316420] }
 0x3c1   :  { %1707 = vrot.lane.b32.xlu2 %v1702_v9, %s3132_s8  ;;  %1841 = vst [vmem:[#allocation1 + $0x10] ss:$2 sm:$0xff] %v1832_v20  ;;  %v1975_v54 = vld [vmem:[#allocation6] sm:$0xf] }
 0x3c7   :  { %v1700_v27 = vld.sshfl [vmem:[#allocation1] sm:$0xff pattern:$0x75316420]  ;;  %v1701_v28 = vld.sshfl [vmem:[#allocation1 + $0x8] sm:$0xff pattern:$0x75316420]  ;;  %1777 = vrot.lane.b32.xlu1 %v1772_v21, %s3138_s14 }
 0x3c8   :  { %1767 = vst [vmem:[#allocation1] ss:$2 sm:$0xff] %v3413_v51  ;;  %1703 = vrot.lane.b32.xlu0 %v1700_v27, %s3132_s8  ;;  %v1844_v31 = vld.sshfl [vmem:[#allocation1 + $0x10] sm:$0xff pattern:$0x75316420] }
 0x3c9   :  { %1913 = vst [vmem:[#allocation1 + $0x10] ss:$2 sm:$0xff] %v1904_v30 }
 0x3cf   :  { %v1770_v34 = vld.sshfl [vmem:[#allocation1] sm:$0xff pattern:$0x75316420]  ;;  %v1771_v35 = vld.sshfl [vmem:[#allocation1 + $0x8] sm:$0xff pattern:$0x75316420]  ;;  %1633 = vrot.lane.b32.xlu1 %v1629_v19, %s3137_s13 }
 0x3d0   :  { %1839 = vst [vmem:[#allocation1] ss:$2 sm:$0xff] %v1831_v33  ;;  %1773 = vrot.lane.b32.xlu2 %v1770_v34, %s3138_s14  ;;  %v1916_v41 = vld.sshfl [vmem:[#allocation1 + $0x10] sm:$0xff pattern:$0x75316420] }
 0x3d1   :  { %1921 = vrot.lane.b32.xlu0 %v1916_v41, %s3140_s16  ;;  %1983 = vst [vmem:[#allocation1 + $0x10] ss:$2 sm:$0xff] %v1974_v40 }
 0x3d7   :  { %v1842_v44 = vld.sshfl [vmem:[#allocation1] sm:$0xff pattern:$0x75316420]  ;;  %v1843_v46 = vld.sshfl [vmem:[#allocation1 + $0x8] sm:$0xff pattern:$0x75316420]  ;;  %1849 = vrot.lane.b32.xlu1 %v1844_v31, %s3139_s15 }
 0x3d8   :  { %1911 = vst [vmem:[#allocation1] ss:$2 sm:$0xff] %v1903_v15  ;;  %1845 = vrot.lane.b32.xlu2 %v1842_v44, %s3139_s15  ;;  %v1986_v50 = vld.sshfl [vmem:[#allocation1 + $0x10] sm:$0xff pattern:$0x75316420] }
 0x3d9   :  { %v849_v49 = vpop.permute.xlu1 %848  ;;  %1775 = vrot.lane.b32.xlu0 %v1771_v35, %s3138_s14  ;;  %2055 = vst [vmem:[#allocation1 + $0x10] ss:$2 sm:$0xff] %v2046_v48 }
 0x3da   :  { %v1037_v53 = vpop.permute.xlu2 %1036 }
 0x3df   :  { %v1914_v55 = vld.sshfl [vmem:[#allocation1] sm:$0xff pattern:$0x75316420]  ;;  %v1915_v57 = vld.sshfl [vmem:[#allocation1 + $0x8] sm:$0xff pattern:$0x75316420]  ;;  %1705 = vrot.lane.b32.xlu1 %v1701_v28, %s3132_s8 }
 0x3e0   :  { %1981 = vst [vmem:[#allocation1] ss:$2 sm:$0xff] %v3413_v51  ;;  %1977 = vrot.lane.b32.xlu2 %v1975_v54, %s3135_s11  ;;  %v2047_v28 = vld [vmem:[#allocation6] sm:$0xf] }
 0x3e1   :  { %v845_v61 = vpop.permute.xlu1 %844  ;;  %1847 = vrot.lane.b32.xlu0 %v1843_v46, %s3139_s15 }
 0x3e2   :  { %v1107_v62 = vpop.permute.xlu2 %1106 }
 0x3e7   :  { %v1984_v1 = vld.sshfl [vmem:[#allocation1] sm:$0xff pattern:$0x75316420]  ;;  %1907 = vrot.lane.b32.xlu1 %v1905_v63, %s3133_s9  ;;  %v1985_v5 = vld.sshfl [vmem:[#allocation1 + $0x8] sm:$0xff pattern:$0x75316420] }
 0x3e8   :  { %1919 = vrot.lane.b32.xlu2 %v1915_v57, %s3140_s16  ;;  %2053 = vst [vmem:[#allocation1] ss:$2 sm:$0xff] %v2045_v0 }
 0x3e9   :  { %v847_v8 = vpop.permute.xlu1 %846  ;;  %1991 = vrot.lane.b32.xlu0 %v1986_v50, %s3141_s17 }
 0x3ea   :  { %v850_v9 = vsel %vm140_vm1, %v845_v61, %v847_v8  ;;  %v851_v14 = vsel %vm140_vm1, %v847_v8, %v849_v49  ;;  %v967_v16 = vpop.permute.xlu0 %966  ;;  %v1181_v17 = vpop.permute.xlu2 %1180 }
 0x3eb   :  { %2870 = vmatpush.msk.msra.mxu2 %vm117_vm4, %v850_v9  ;;  %2872 = vmatpush.msk.msra.mxu3 %vm117_vm4, %v851_v14 }
 0x3ec   :  { %2871 = vmatmul.msk.f32.vlgmr.msra.gmra.mxu2 %vm143_vm0, %v3418_v56  ;;  %2873 = vmatmul.msk.f32.vlgmr.msra.gmra.mxu3 %vm143_vm0, %v3418_v56  ;;  %v2058_v56 = vld.sshfl [vmem:[#allocation1 + $0x10] sm:$0xff pattern:$0x75316420] }
 0x3ef   :  { %1917 = vrot.lane.b32.xlu1 %v1914_v55, %s3140_s16  ;;  %v2056_v51 = vld.sshfl [vmem:[#allocation1] sm:$0xff pattern:$0x75316420]  ;;  %v2057_v40 = vld.sshfl [vmem:[#allocation1 + $0x8] sm:$0xff pattern:$0x75316420] }
 0x3f0   :  { %1989 = vrot.lane.b32.xlu2 %v1985_v5, %s3141_s17 }
 0x3f1   :  { %v969_v19 = vpop.permute.xlu1 %968  ;;  %2059 = vrot.lane.b32.xlu0 %v2056_v51, %s3142_s18 }
 0x3f2   :  { %v971_v20 = vsel %vm273_vm2, %v967_v16, %v969_v19  ;;  %v1039_v21 = vpop.permute.xlu0 %1038 }
 0x3f3   :  { %v1042_v24 = vsel %vm353_vm3, %v1037_v53, %v1039_v21  ;;  %2880 = vmatpush.msk.msrb.mxu3 %vm117_vm4, %v971_v20  ;;  %v1325_v27 = vpop.permute.xlu2 %1324 }
 0x3f4   :  { %2881 = vmatmul.msk.f32.vlgmr.msrb.gmra.mxu3 %vm143_vm0, %v3426_v2  ;;  %2882 = vmatpush.msk.msra.mxu0 %vm117_vm4, %v1042_v24 }
 0x3f5   :  { %2883 = vmatmul.msk.f32.vlgmr.msra.gmra.mxu0 %vm143_vm0, %v3430_v4 }
 0x3f7   :  { %1987 = vrot.lane.b32.xlu1 %v1984_v1, %s3141_s17 }
 0x3f8   :  { %2063 = vrot.lane.b32.xlu2 %v2058_v56, %s3142_s18 }
 0x3f9   :  { %v1041_v30 = vpop.permute.xlu1 %1040  ;;  %2049 = vrot.lane.b32.xlu0 %v2047_v28, %s3140_s16 }
 0x3fa   :  { %v1043_v31 = vsel %vm353_vm3, %v1039_v21, %v1041_v30 }
 0x3fb   :  { %2884 = vmatpush.msk.msra.mxu1 %vm117_vm4, %v1043_v31  ;;  %v1183_v33 = vpop.permute.xlu0 %1182  ;;  %v1253_v35 = vpop.permute.xlu2 %1252 }
 0x3fc   :  { %2885 = vmatmul.msk.f32.vlgmr.msra.gmra.mxu1 %vm143_vm0, %v3430_v4  ;;  %v1185_v34 = vsel %vm504_vm8, %v1181_v17, %v1183_v33 }
 0x3fd   :  { %2892 = vmatpush.msk.msrb.mxu1 %vm117_vm4, %v1185_v34 }
 0x3ff   :  { %2061 = vrot.lane.b32.xlu1 %v2057_v40, %s3142_s18 }
 0x401   :  { %v965_v41 = vpop.permute.xlu1 %964 }
 0x402   :  { %v970_v42 = vsel %vm273_vm2, %v965_v41, %v967_v16 }
 0x403   :  { %2878 = vmatpush.msk.msrb.mxu2 %vm117_vm4, %v970_v42  ;;  %v1109_v15 = vpop.permute.xlu0 %1108  ;;  %v1397_v44 = vpop.permute.xlu2 %1396 }
 0x404   :  { %2879 = vmatmul.msk.f32.vlgmr.msrb.gmra.mxu2 %vm143_vm0, %v3426_v2  ;;  %2893 = vmatmul.msk.f32.vlgmr.msrb.gmra.mxu1 %vm143_vm0, %v3440_v11  ;;  %v1112_v4 = vsel %vm424_vm6, %v1107_v62, %v1109_v15 }
 0x405   :  { %2886 = vmatpush.msk.msra.mxu2 %vm117_vm4, %v1112_v4 }
 0x409   :  { %v1111_v46 = vpop.permute.xlu1 %1110 }
 0x40a   :  { %v1113_v48 = vsel %vm424_vm6, %v1109_v15, %v1111_v46 }
 0x40b   :  { %2888 = vmatpush.msk.msra.mxu3 %vm117_vm4, %v1113_v48  ;;  %v1255_v49 = vpop.permute.xlu0 %1254  ;;  %v1636_v53 = vpop.permute.xlu2 %1635 }
 0x40c   :  { %2887 = vmatmul.msk.f32.vlgmr.msra.gmra.mxu2 %vm143_vm0, %v3450_v22  ;;  %2889 = vmatmul.msk.f32.vlgmr.msra.gmra.mxu3 %vm143_vm0, %v3450_v22  ;;  %v1257_v2 = vsel %vm584_vm7, %v1253_v35, %v1255_v49 }
 0x40d   :  { %2896 = vmatpush.msk.msrb.mxu3 %vm117_vm4, %v1257_v2  ;;  %v925_v2 = vpop.f32.mrf.mxu0 }
 0x411   :  { %v1179_v50 = vpop.permute.xlu1 %1178 }
 0x412   :  { %v1184_v54 = vsel %vm504_vm8, %v1179_v50, %v1181_v17 }
 0x413   :  { %2890 = vmatpush.msk.msrb.mxu0 %vm117_vm4, %v1184_v54  ;;  %v1321_v55 = vpop.permute.xlu0 %1320  ;;  %v1512_v61 = vpop.permute.xlu2 %1511 }
 0x414   :  { %2891 = vmatmul.msk.f32.vlgmr.msrb.gmra.mxu0 %vm143_vm0, %v3440_v11  ;;  %2897 = vmatmul.msk.f32.vlgmr.msrb.gmra.mxu3 %vm143_vm0, %v3442_v12 }
 0x419   :  { %v1251_v57 = vpop.permute.xlu1 %1250 }
 0x41a   :  { %v1256_v22 = vsel %vm584_vm7, %v1251_v57, %v1253_v35 }
 0x41b   :  { %2894 = vmatpush.msk.msrb.mxu2 %vm117_vm4, %v1256_v22  ;;  %v1393_v62 = vpop.permute.xlu0 %1392  ;;  %v1708_v8 = vpop.permute.xlu2 %1707 }
 0x41c   :  { %2895 = vmatmul.msk.f32.vlgmr.msrb.gmra.mxu2 %vm143_vm0, %v3442_v12 }
 0x421   :  { %v1323_v63 = vpop.permute.xlu1 %1322 }
 0x422   :  { %v1326_v0 = vsel %vm655_vm11, %v1321_v55, %v1323_v63  ;;  %v1327_v1 = vsel %vm655_vm11, %v1323_v63, %v1325_v27 }
 0x423   :  { %2898 = vmatpush.msk.msra.mxu0 %vm117_vm4, %v1326_v0  ;;  %2900 = vmatpush.msk.msra.mxu1 %vm117_vm4, %v1327_v1  ;;  %v1514_v11 = vpop.permute.xlu0 %1513 }
 0x424   :  { %2899 = vmatmul.msk.f32.vlgmr.msra.gmra.mxu0 %vm143_vm0, %v3460_v32  ;;  %2901 = vmatmul.msk.f32.vlgmr.msra.gmra.mxu1 %vm143_vm0, %v3460_v32  ;;  %v1517_v5 = vsel %vm140_vm1, %v1512_v61, %v1514_v11 }
 0x425   :  { %2906 = vmatpush.msk.msrb.mxu0 %vm117_vm4, %v1517_v5 }
 0x429   :  { %v1516_v12 = vpop.permute.xlu1 %1515 }
 0x42a   :  { %v1518_v9 = vsel %vm140_vm1, %v1514_v11, %v1516_v12  ;;  %v1774_v14 = vpop.permute.xlu2 %1773 }
 0x42b   :  { %2908 = vmatpush.msk.msrb.mxu1 %vm117_vm4, %v1518_v9 }
 0x42c   :  { %2907 = vmatmul.msk.f32.vlgmr.msrb.gmra.mxu0 %vm143_vm0, %v3454_v26  ;;  %2909 = vmatmul.msk.f32.vlgmr.msrb.gmra.mxu1 %vm143_vm0, %v3454_v26 }
 0x431   :  { %v1395_v16 = vpop.permute.xlu1 %1394 }
 0x432   :  { %v1398_v32 = vsel %vm735_vm12, %v1393_v62, %v1395_v16  ;;  %v1399_v17 = vsel %vm735_vm12, %v1395_v16, %v1397_v44  ;;  %v1632_v51 = vpop.permute.xlu0 %1631  ;;  %v1846_v26 = vpop.permute.xlu2 %1845 }
 0x433   :  { %2902 = vmatpush.msk.msra.mxu2 %vm117_vm4, %v1398_v32  ;;  %2904 = vmatpush.msk.msra.mxu3 %vm117_vm4, %v1399_v17 }
 0x434   :  { %2903 = vmatmul.msk.f32.vlgmr.msra.gmra.mxu2 %vm143_vm0, %v3452_v25  ;;  %2905 = vmatmul.msk.f32.vlgmr.msra.gmra.mxu3 %vm143_vm0, %v3452_v25 }
 0x435   :  { %2910 = vmatpush.msk.msrb.mxu2 %vm117_vm4, %v3434_v6  ;;  %2912 = vmatpush.msk.msrb.mxu3 %vm117_vm4, %v3436_v7 }
 0x439   :  { %v1778_v19 = vpop.permute.xlu1 %1777 }
 0x43a   :  { %v1704_v20 = vpop.permute.xlu0 %1703  ;;  %v1978_v24 = vpop.permute.xlu2 %1977 }
 0x43c   :  { %2911 = vmatmul.msk.f32.vlgmr.msrb.gmra.mxu2 %vm143_vm0, %v3354_v47  ;;  %2913 = vmatmul.msk.f32.vlgmr.msrb.gmra.mxu3 %vm143_vm0, %v3354_v47 }
 0x441   :  { %v1634_v21 = vpop.permute.xlu1 %1633 }
 0x442   :  { %v1637_v27 = vsel %vm273_vm2, %v1632_v51, %v1634_v21  ;;  %v1638_v25 = vsel %vm273_vm2, %v1634_v21, %v1636_v53  ;;  %v1920_v56 = vpop.permute.xlu2 %1919 }
 0x443   :  { %2914 = vmatpush.msk.msra.mxu0 %vm117_vm4, %v1637_v27  ;;  %2916 = vmatpush.msk.msra.mxu1 %vm117_vm4, %v1638_v25  ;;  %v1922_v6 = vpop.permute.xlu0 %1921 }
 0x444   :  { %2915 = vmatmul.msk.f32.vlgmr.msra.gmra.mxu0 %vm143_vm0, %v3473_v43  ;;  %2917 = vmatmul.msk.f32.vlgmr.msra.gmra.mxu1 %vm143_vm0, %v3473_v43  ;;  %v1924_v31 = vsel %vm584_vm7, %v1920_v56, %v1922_v6 }
 0x449   :  { %v1850_v7 = vpop.permute.xlu1 %1849 }
 0x44a   :  { %v1990_v42 = vpop.permute.xlu2 %1989 }
 0x44b   :  { %v1776_v47 = vpop.permute.xlu0 %1775 }
 0x44c   :  { %v1779_v28 = vsel %vm424_vm6, %v1774_v14, %v1776_v47  ;;  %v1780_v30 = vsel %vm424_vm6, %v1776_v47, %v1778_v19 }
 0x44d   :  { %2922 = vmatpush.msk.msrb.mxu0 %vm117_vm4, %v1779_v28  ;;  %2924 = vmatpush.msk.msrb.mxu1 %vm117_vm4, %v1780_v30 }
 0x44e   :  { %2923 = vmatmul.msk.f32.vlgmr.msrb.gmra.mxu0 %vm143_vm0, %v3468_v39  ;;  %2925 = vmatmul.msk.f32.vlgmr.msrb.gmra.mxu1 %vm143_vm0, %v3468_v39 }
 0x44f   :  { %2932 = vmatpush.msk.msra.mxu1 %vm117_vm4, %v1924_v31 }
 0x451   :  { %v1706_v43 = vpop.permute.xlu1 %1705 }
 0x452   :  { %v1709_v33 = vsel %vm353_vm3, %v1704_v20, %v1706_v43  ;;  %v1710_v34 = vsel %vm353_vm3, %v1706_v43, %v1708_v8  ;;  %v2064_v54 = vpop.permute.xlu2 %2063 }
 0x453   :  { %2918 = vmatpush.msk.msra.mxu2 %vm117_vm4, %v1709_v33  ;;  %2920 = vmatpush.msk.msra.mxu3 %vm117_vm4, %v1710_v34  ;;  %v1848_v35 = vpop.permute.xlu0 %1847 }
 0x454   :  { %2919 = vmatmul.msk.f32.vlgmr.msra.gmra.mxu2 %vm143_vm0, %v3465_v36  ;;  %2921 = vmatmul.msk.f32.vlgmr.msra.gmra.mxu3 %vm143_vm0, %v3465_v36  ;;  %v1851_v39 = vsel %vm504_vm8, %v1846_v26, %v1848_v35  ;;  %v1852_v40 = vsel %vm504_vm8, %v1848_v35, %v1850_v7 }
 0x455   :  { %2926 = vmatpush.msk.msrb.mxu2 %vm117_vm4, %v1851_v39  ;;  %2928 = vmatpush.msk.msrb.mxu3 %vm117_vm4, %v1852_v40 }
 0x459   :  { %v1908_v41 = vpop.permute.xlu1 %1907 }
 0x45a   :  { %2933 = vmatmul.msk.f32.vlgmr.msra.gmra.mxu1 %vm143_vm0, %v1908_v41 }
 0x45b   :  { %v1992_v15 = vpop.permute.xlu0 %1991 }
 0x45c   :  { %2927 = vmatmul.msk.f32.vlgmr.msrb.gmra.mxu2 %vm143_vm0, %v3482_v58  ;;  %2929 = vmatmul.msk.f32.vlgmr.msrb.gmra.mxu3 %vm143_vm0, %v3482_v58  ;;  %v1994_v36 = vsel %vm655_vm11, %v1990_v42, %v1992_v15  ;;  %v945_v58 = vpop.f32.mrf.mxu1 }
 0x45d   :  { %2936 = vmatpush.msk.msra.mxu3 %vm117_vm4, %v1994_v36 }
 0x461   :  { %v1918_v4 = vpop.permute.xlu1 %1917 }
 0x462   :  { %v1923_v44 = vsel %vm584_vm7, %v1918_v4, %v1920_v56 }
 0x463   :  { %2930 = vmatpush.msk.msra.mxu0 %vm117_vm4, %v1923_v44  ;;  %v2060_v46 = vpop.permute.xlu0 %2059 }
 0x464   :  { %2931 = vmatmul.msk.f32.vlgmr.msra.gmra.mxu0 %vm143_vm0, %v1908_v41  ;;  %2937 = vmatmul.msk.f32.vlgmr.msra.gmra.mxu3 %vm143_vm0, %v1978_v24 }
 0x469   :  { %v1988_v48 = vpop.permute.xlu1 %1987 }
 0x46a   :  { %v1993_v49 = vsel %vm655_vm11, %v1988_v48, %v1990_v42 }
 0x46b   :  { %2934 = vmatpush.msk.msra.mxu2 %vm117_vm4, %v1993_v49  ;;  %v2050_v61 = vpop.permute.xlu0 %2049 }
 0x46c   :  { %2935 = vmatmul.msk.f32.vlgmr.msra.gmra.mxu2 %vm143_vm0, %v1978_v24 }
 0x46f   :  { %v875_v50 = vpop.f32.mrf.mxu2  ;;  %v895_v53 = vpop.f32.mrf.mxu3 }
 0x470   :  { %v926_v55 = vadd.f32 %v925_v2, %v875_v50  ;;  %v946_v57 = vadd.f32 %v945_v58, %v895_v53 }
 0x471   :  { %v2062_v22 = vpop.permute.xlu1 %2061 }
 0x472   :  { %v2065_v62 = vsel %vm735_vm12, %v2060_v46, %v2062_v22  ;;  %v2066_v63 = vsel %vm735_vm12, %v2062_v22, %v2064_v54  ;;  %v1067_v9 = vpop.f32.mrf.mxu0 }
 0x473   :  { %2938 = vmatpush.msk.msrb.mxu0 %vm117_vm4, %v2065_v62  ;;  %2940 = vmatpush.msk.msrb.mxu1 %vm117_vm4, %v2066_v63 }
 0x474   :  { %2939 = vmatmul.msk.f32.vlgmr.msrb.gmra.mxu0 %vm143_vm0, %v2050_v61  ;;  %2941 = vmatmul.msk.f32.vlgmr.msrb.gmra.mxu1 %vm143_vm0, %v2050_v61 }
 0x477   :  { %v1015_v0 = vpop.f32.mrf.mxu3 }
 0x478   :  { %v1019_v1 = vadd.f32 %v1015_v0, %v946_v57 }
 0x479   :  { %v1087_v11 = vpop.f32.mrf.mxu1 }
 0x47a   :  { %v1091_v5 = vadd.f32 %v1087_v11, %v1019_v1 }
 0x481   :  { %v1229_v26 = vpop.f32.mrf.mxu1 }
 0x487   :  { %v995_v8 = vpop.f32.mrf.mxu2 }
 0x488   :  { %v1018_v12 = vadd.f32 %v995_v8, %v926_v55 }
 0x48a   :  { %v1090_v14 = vadd.f32 %v1067_v9, %v1018_v12 }
 0x48f   :  { %v1137_v16 = vpop.f32.mrf.mxu2  ;;  %v1157_v32 = vpop.f32.mrf.mxu3 }
 0x490   :  { %v1160_v17 = vadd.f32 %v1137_v16, %v1090_v14  ;;  %v1161_v51 = vadd.f32 %v1157_v32, %v1091_v5 }
 0x491   :  { %v1209_v19 = vpop.f32.mrf.mxu0 }
 0x492   :  { %v1232_v20 = vadd.f32 %v1209_v19, %v1160_v17  ;;  %v1233_v21 = vadd.f32 %v1229_v26, %v1161_v51 }
 0x497   :  { %v1301_v24 = vpop.f32.mrf.mxu3 }
 0x498   :  { %v1305_v27 = vadd.f32 %v1301_v24, %v1233_v21 }
 0x49f   :  { %v1281_v25 = vpop.f32.mrf.mxu2 }
 0x4a0   :  { %v1304_v6 = vadd.f32 %v1281_v25, %v1232_v20 }
 0x4a1   :  { %v1351_v7 = vpop.f32.mrf.mxu0  ;;  %v1371_v56 = vpop.f32.mrf.mxu1 }
 0x4a2   :  { %v1374_v47 = vadd.f32 %v1351_v7, %v1304_v6  ;;  %v1375_v28 = vadd.f32 %v1371_v56, %v1305_v27 }
 0x4a9   :  { %v1542_v34 = vpop.f32.mrf.mxu0  ;;  %v1562_v35 = vpop.f32.mrf.mxu1 }
 0x4b7   :  { %v1423_v30 = vpop.f32.mrf.mxu2  ;;  %v1443_v31 = vpop.f32.mrf.mxu3 }
 0x4b8   :  { %v3627_v43 = vadd.f32 %v1423_v30, %v1374_v47  ;;  %v3629_v33 = vadd.f32 %v1443_v31, %v1375_v28 }
 0x4bf   :  { %v1612_v39 = vpop.f32.mrf.mxu3  ;;  %v1592_v40 = vpop.f32.mrf.mxu2 }
 0x4c0   :  { %v1593_v4 = vadd.f32 %v1592_v40, %v1542_v34  ;;  %v1613_v44 = vadd.f32 %v1612_v39, %v1562_v35 }
 0x4c1   :  { %v1662_v41 = vpop.f32.mrf.mxu0  ;;  %v1682_v42 = vpop.f32.mrf.mxu1 }
 0x4c2   :  { %v1685_v49 = vadd.f32 %v1662_v41, %v1593_v4  ;;  %v1686_v58 = vadd.f32 %v1682_v42, %v1613_v44 }
 0x4cb   :  { %v1804_v46 = vpop.f32.mrf.mxu0  ;;  %v1824_v48 = vpop.f32.mrf.mxu1 }
 0x4d7   :  { %v1754_v15 = vpop.f32.mrf.mxu3  ;;  %v1734_v36 = vpop.f32.mrf.mxu2 }
 0x4d8   :  { %v1757_v50 = vadd.f32 %v1734_v36, %v1685_v49  ;;  %v1758_v53 = vadd.f32 %v1754_v15, %v1686_v58  ;;  %v1968_v22 = vpop.f32.mrf.mxu1  ;;  %v2160_v49 = vld [vmem:[#allocation8] sm:$0xf] }
 0x4d9   :  { %v2281_v58 = vld [vmem:[#allocation8] sm:$0xf] }
 0x4da   :  { %v1827_v55 = vadd.f32 %v1804_v46, %v1757_v50  ;;  %v1828_v57 = vadd.f32 %v1824_v48, %v1758_v53  ;;  %v2495_v50 = vld [vmem:[#allocation8] sm:$0xf] }
 0x4db   :  { %v2353_v53 = vld [vmem:[#allocation8] sm:$0xf] }
 0x4df   :  { %v1896_v2 = vpop.f32.mrf.mxu3  ;;  %v1876_v54 = vpop.f32.mrf.mxu2 }
 0x4e0   :  { %v1899_v62 = vadd.f32 %v1876_v54, %v1827_v55  ;;  %v1900_v63 = vadd.f32 %v1896_v2, %v1828_v57  ;;  %v2423_v2 = vld [vmem:[#allocation8] sm:$0xf] }
 0x4e1   :  { %v1948_v61 = vpop.f32.mrf.mxu0  ;;  %v2567_v54 = vld [vmem:[#allocation8] sm:$0xf] }
 0x4e2   :  { %v1971_v1 = vadd.f32 %v1948_v61, %v1899_v62  ;;  %v1972_v11 = vadd.f32 %v1968_v22, %v1900_v63  ;;  %v2709_v55 = vld [vmem:[#allocation8] sm:$0xf] }
 0x4e7   :  { %v2038_v0 = vpop.f32.mrf.mxu3 }
 0x4e8   :  { %v2042_v8 = vadd.f32 %v2038_v0, %v1972_v11 }
 0x4ef   :  { %v2018_v5 = vpop.f32.mrf.mxu2 }
 0x4f0   :  { %v2041_v12 = vadd.f32 %v2018_v5, %v1971_v1 }
 0x4f1   :  { %v2090_v9 = vpop.f32.mrf.mxu0  ;;  %v2110_v14 = vpop.f32.mrf.mxu1 }
 0x4f2   :  { %v2113_v16 = vadd.f32 %v2090_v9, %v2041_v12  ;;  %v2114_v32 = vadd.f32 %v2110_v14, %v2042_v8 }
 0x4f4   :  { %v2115_v17 = vsel %vm117_vm4, %v2113_v16, 0.0  ;;  %v2116_v51 = vsel %vm117_vm4, %v2114_v32, 0.0 }
 0x4f5   :  { %v2117_v26 = vadd.f32 %v2116_v51, %v2115_v17 }
 0x4f7   :  { %2118 = vadd.xlane.f32.xlu1 %v2117_v26 }
 0x510   :  { %2569 = vrot.lane.b32.xlu1 %v2567_v54, %s3133_s9 }
 0x56a   :  { %v2119_v19 = vpop.xlane.xlu1 %2118 }
 0x56b   :  { %v2120_v20 = vmul.f32 0.00390625, %v2119_v19 }
 0x56d   :  { %v2121_v21 = vsub.f32 %v2113_v16, %v2120_v20  ;;  %v2122_v24 = vsub.f32 %v2114_v32, %v2120_v20 }
 0x56f   :  { %v2123_v27 = vmul.f32 %v2121_v21, %v2121_v21  ;;  %v2124_v25 = vmul.f32 %v2122_v24, %v2122_v24 }
 0x571   :  { %v2125_v6 = vsel %vm117_vm4, %v2123_v27, 0.0  ;;  %v2126_v7 = vsel %vm117_vm4, %v2124_v25, 0.0 }
 0x572   :  { %v2127_v56 = vadd.f32 %v2126_v7, %v2125_v6 }
 0x574   :  { %2128 = vadd.xlane.f32.xlu2 %v2127_v56 }
 0x58c   :  { %2355 = vrot.lane.b32.xlu2 %v2353_v53, %s3130_s6 }
 0x594   :  { %2711 = vrot.lane.b32.xlu2 %v2709_v55, %s3140_s16  ;;  %v2570_v55 = vpop.permute.xlu1 %2569 }
 0x5e7   :  { %v2129_v47 = vpop.xlane.xlu2 %2128 }
 0x5e8   :  { %v2130_v28 = vmul.f32 0.00390625, %v2129_v47 }
 0x5ea   :  { %v2131_v30 = vadd.f32 1e-05, %v2130_v28 }
 0x5ec   :  { %3007 = vrsqrt.f32 %v2131_v30  ;;  %vm2138_vm14 = vweird.f32 %v2131_v30 }
 0x5f2   :  { %v3008_v31 = vpop.eup %3007 }
 0x5f3   :  { %v2133_v34 = vmul.f32 %v3008_v31, %v2131_v30  ;;  %vm2139_vm13 = vweird.f32 %v3008_v31 }
 0x5f4   :  { %vm2140_vm15 = vmor %vm2138_vm14, %vm2139_vm13 }
 0x5f5   :  { %v2134_v35 = vmul.f32 %v3008_v31, %v2133_v34 }
 0x5f7   :  { %v2135_v39 = vmul.f32 0.5, %v2134_v35 }
 0x5f9   :  { %v2136_v40 = vsub.f32 1.5, %v2135_v39 }
 0x5fb   :  { %v2137_v41 = vmul.f32 %v3008_v31, %v2136_v40 }
 0x5fd   :  { %v2141_v42 = vsel %vm2140_vm15, %v3008_v31, %v2137_v41 }
 0x5fe   :  { %v2142_v15 = vmul.f32 %v2141_v42, %v2121_v21  ;;  %v2143_v36 = vmul.f32 %v2141_v42, %v2122_v24 }
 0x600   :  { %v2145_v4 = vmax.f32 %v2143_v36, 0.0  ;;  %v2144_v44 = vmax.f32 %v2142_v15, 0.0  ;;  %v2637_v36 = vld [vmem:[#allocation8] sm:$0xf] }
 0x602   :  { %v2148_v46 = vrot.slane %v2145_v4, 4 }
 0x604   :  { %v2149_v48 = vsel %vm117_vm4, %v2144_v44, %v2148_v46  ;;  %v2356_v44 = vpop.permute.xlu2 %2355 }
 0x605   :  { %2150 = vrot.lane.b32.xlu0 %v2149_v48, %s3122_s0 }
 0x60c   :  { %v3699_v48 = vpop.permute.xlu2 %2711 }
 0x60d   :  { %2163 = vrot.lane.b32.xlu0 %v2160_v49, %s3129_s5 }
 0x615   :  { %2283 = vrot.lane.b32.xlu0 %v2281_v58, %s3131_s7  ;;  %v1448_v58 = vsel %vm117_vm4, %v3627_v43, 0.0 }
 0x61d   :  { %2425 = vrot.lane.b32.xlu0 %v2423_v2, %s3132_s8  ;;  %v1449_v2 = vsel %vm117_vm4, %v3629_v33, 0.0 }
 0x625   :  { %2497 = vrot.lane.b32.xlu0 %v2495_v50, %s3134_s10  ;;  %v1450_v50 = vadd.f32 %v1449_v2, %v1448_v58 }
 0x677   :  { %v2151_v57 = vpop.permute.xlu0 %2150 }
 0x678   :  { %v2152_v22 = vrot.slane %v2151_v57, 4 }
 0x67a   :  { %v2153_v61 = vsel %vm104_vm9, %v2152_v22, %v2151_v57  ;;  %2157 = vst.msk [vmem:[#allocation2 + $0x14] sm:$0xf] %vm58_vm5, %v2152_v22 }
 0x67b   :  { %2156 = vst.msk [vmem:[#allocation2 + $0xc] sm:$0xff] %vm3195_vm10, %v2153_v61 }
 0x681   :  { %v2161_v62 = vld [vmem:[#allocation2 + $0x14] sm:$0xf] }
 0x682   :  { %v3648_v63 = vld [vmem:[#allocation2 + $0xc] sm:$0xff]  ;;  %2169 = vst [vmem:[#allocation1 + $0x10] ss:$2 sm:$0xff] %v2161_v62  ;;  %v2278_v0 = vld [vmem:[#allocation2 + $0x14] sm:$0xf] }
 0x683   :  { %2167 = vst [vmem:[#allocation1] ss:$2 sm:$0xff] %v3648_v63  ;;  %v2159_v1 = vmul.f32 %v3648_v63, %v3178_v13  ;;  %v2280_v8 = vmul.f32 %v2278_v0, %v3206_v29  ;;  %v2350_v23 = vld [vmem:[#allocation2 + $0x14] sm:$0xf]  ;;  %v2279_v9 = vmul.f32 %v3648_v63, %v3217_v38  ;;  %v2351_v29 = vmul.f32 %v3648_v63, %v3226_v45 }
 0x684   :  { %v2352_v32 = vmul.f32 %v2350_v23, %v3214_v37  ;;  %v2422_v38 = vld [vmem:[#allocation2 + $0x14] sm:$0xf]  ;;  %v2493_v27 = vmul.f32 %v3648_v63, %v3242_v60  ;;  %v2565_v56 = vmul.f32 %v3648_v63, %v3251_v3  ;;  %v2707_v39 = vmul.f32 %v3648_v63, %v3266_v18  ;;  %v2164_v18 = vpop.permute.xlu0 %2163 }
 0x685   :  { %v2492_v26 = vld [vmem:[#allocation2 + $0x14] sm:$0xf] }
 0x686   :  { %v2494_v21 = vmul.f32 %v2492_v26, %v3233_v52  ;;  %v2564_v24 = vld [vmem:[#allocation2 + $0x14] sm:$0xf] }
 0x687   :  { %v2566_v7 = vmul.f32 %v2564_v24, %v3239_v59  ;;  %v2636_v47 = vld [vmem:[#allocation2 + $0x14] sm:$0xf] }
 0x688   :  { %v2706_v59 = vld [vmem:[#allocation2 + $0x14] sm:$0xf] }
 0x689   :  { %v2172_v12 = vld.sshfl [vmem:[#allocation1 + $0x10] sm:$0xff pattern:$0x75316420]  ;;  %v2708_v35 = vmul.f32 %v2706_v59, %v3258_v10 }
 0x68a   :  { %v2170_v11 = vld.sshfl [vmem:[#allocation1] sm:$0xff pattern:$0x75316420]  ;;  %v2171_v5 = vld.sshfl [vmem:[#allocation1 + $0x8] sm:$0xff pattern:$0x75316420]  ;;  %2177 = vrot.lane.b32.xlu0 %v2172_v12, %s3136_s12 }
 0x68b   :  { %2228 = vst [vmem:[#allocation1] ss:$2 sm:$0xff] %v2159_v1 }
 0x68c   :  { %2289 = vst [vmem:[#allocation1 + $0x10] ss:$2 sm:$0xff] %v2280_v8  ;;  %v2284_v4 = vpop.permute.xlu0 %2283 }
 0x692   :  { %v2229_v14 = vld.sshfl [vmem:[#allocation1] sm:$0xff pattern:$0x75316420]  ;;  %v2230_v16 = vld.sshfl [vmem:[#allocation1 + $0x8] sm:$0xff pattern:$0x75316420]  ;;  %2173 = vrot.lane.b32.xlu0 %v2170_v11, %s3136_s12 }
 0x693   :  { %2287 = vst [vmem:[#allocation1] ss:$2 sm:$0xff] %v2279_v9  ;;  %2946 = vmatpush.msk.msra.mxu0 %vm117_vm4, %v2229_v14  ;;  %2948 = vmatpush.msk.msra.mxu1 %vm117_vm4, %v2230_v16  ;;  %v2292_v13 = vld.sshfl [vmem:[#allocation1 + $0x10] sm:$0xff pattern:$0x75316420] }
 0x694   :  { %2361 = vst [vmem:[#allocation1 + $0x10] ss:$2 sm:$0xff] %v2352_v32  ;;  %2947 = vmatmul.msk.f32.vlgmr.msra.gmra.mxu0 %vm143_vm0, %v2160_v49  ;;  %2949 = vmatmul.msk.f32.vlgmr.msra.gmra.mxu1 %vm143_vm0, %v2160_v49  ;;  %v2426_v46 = vpop.permute.xlu0 %2425 }
 0x69a   :  { %v2290_v17 = vld.sshfl [vmem:[#allocation1] sm:$0xff pattern:$0x75316420]  ;;  %v2291_v51 = vld.sshfl [vmem:[#allocation1 + $0x8] sm:$0xff pattern:$0x75316420]  ;;  %2175 = vrot.lane.b32.xlu0 %v2171_v5, %s3136_s12 }
 0x69b   :  { %2359 = vst [vmem:[#allocation1] ss:$2 sm:$0xff] %v2351_v29  ;;  %2295 = vrot.lane.b32.xlu2 %v2291_v51, %s3137_s13  ;;  %2293 = vrot.lane.b32.xlu1 %v2290_v17, %s3137_s13  ;;  %v2364_v37 = vld.sshfl [vmem:[#allocation1 + $0x10] sm:$0xff pattern:$0x75316420] }
 0x69c   :  { %2431 = vst [vmem:[#allocation1 + $0x10] ss:$2 sm:$0xff] %v2422_v38  ;;  %v2498_v49 = vpop.permute.xlu0 %2497 }
 0x6a2   :  { %v2362_v19 = vld.sshfl [vmem:[#allocation1] sm:$0xff pattern:$0x75316420]  ;;  %v2363_v20 = vld.sshfl [vmem:[#allocation1 + $0x8] sm:$0xff pattern:$0x75316420]  ;;  %2297 = vrot.lane.b32.xlu0 %v2292_v13, %s3137_s13 }
 0x6a3   :  { %2429 = vst [vmem:[#allocation1] ss:$2 sm:$0xff] %v3648_v63  ;;  %v2434_v45 = vld.sshfl [vmem:[#allocation1 + $0x10] sm:$0xff pattern:$0x75316420]  ;;  %2365 = vrot.lane.b32.xlu2 %v2362_v19, %s3132_s8 }
 0x6a4   :  { %2439 = vrot.lane.b32.xlu1 %v2434_v45, %s3138_s14  ;;  %2503 = vst [vmem:[#allocation1 + $0x10] ss:$2 sm:$0xff] %v2494_v21 }
 0x6aa   :  { %v2432_v25 = vld.sshfl [vmem:[#allocation1] sm:$0xff pattern:$0x75316420]  ;;  %v2433_v6 = vld.sshfl [vmem:[#allocation1 + $0x8] sm:$0xff pattern:$0x75316420]  ;;  %2369 = vrot.lane.b32.xlu0 %v2364_v37, %s3132_s8 }
 0x6ab   :  { %2501 = vst [vmem:[#allocation1] ss:$2 sm:$0xff] %v2493_v27  ;;  %2437 = vrot.lane.b32.xlu2 %v2433_v6, %s3138_s14  ;;  %v2506_v52 = vld.sshfl [vmem:[#allocation1 + $0x10] sm:$0xff pattern:$0x75316420] }
 0x6ac   :  { %2367 = vrot.lane.b32.xlu1 %v2363_v20, %s3132_s8  ;;  %2575 = vst [vmem:[#allocation1 + $0x10] ss:$2 sm:$0xff] %v2566_v7 }
 0x6b2   :  { %v2504_v28 = vld.sshfl [vmem:[#allocation1] sm:$0xff pattern:$0x75316420]  ;;  %v2505_v30 = vld.sshfl [vmem:[#allocation1 + $0x8] sm:$0xff pattern:$0x75316420]  ;;  %2435 = vrot.lane.b32.xlu0 %v2432_v25, %s3138_s14 }
 0x6b3   :  { %2573 = vst [vmem:[#allocation1] ss:$2 sm:$0xff] %v2565_v56  ;;  %v2578_v60 = vld.sshfl [vmem:[#allocation1 + $0x10] sm:$0xff pattern:$0x75316420] }
 0x6b4   :  { %2511 = vrot.lane.b32.xlu1 %v2506_v52, %s3139_s15  ;;  %2645 = vst [vmem:[#allocation1 + $0x10] ss:$2 sm:$0xff] %v2636_v47  ;;  %2583 = vrot.lane.b32.xlu2 %v2578_v60, %s3140_s16 }
 0x6ba   :  { %v2576_v31 = vld.sshfl [vmem:[#allocation1] sm:$0xff pattern:$0x75316420]  ;;  %v2577_v34 = vld.sshfl [vmem:[#allocation1 + $0x8] sm:$0xff pattern:$0x75316420]  ;;  %2507 = vrot.lane.b32.xlu0 %v2504_v28, %s3139_s15 }
 0x6bb   :  { %2643 = vst [vmem:[#allocation1] ss:$2 sm:$0xff] %v3648_v63  ;;  %v2648_v3 = vld.sshfl [vmem:[#allocation1 + $0x10] sm:$0xff pattern:$0x75316420] }
 0x6bc   :  { %2579 = vrot.lane.b32.xlu1 %v2576_v31, %s3140_s16  ;;  %2717 = vst [vmem:[#allocation1 + $0x10] ss:$2 sm:$0xff] %v2708_v35  ;;  %2509 = vrot.lane.b32.xlu2 %v2505_v30, %s3139_s15 }
 0x6c2   :  { %v2647_v40 = vld.sshfl [vmem:[#allocation1 + $0x8] sm:$0xff pattern:$0x75316420]  ;;  %v2646_v41 = vld.sshfl [vmem:[#allocation1] sm:$0xff pattern:$0x75316420]  ;;  %2581 = vrot.lane.b32.xlu0 %v2577_v34, %s3140_s16 }
 0x6c3   :  { %2715 = vst [vmem:[#allocation1] ss:$2 sm:$0xff] %v2707_v39  ;;  %v2720_v15 = vld.sshfl [vmem:[#allocation1 + $0x10] sm:$0xff pattern:$0x75316420] }
 0x6c4   :  { %2649 = vrot.lane.b32.xlu1 %v2646_v41, %s3141_s17 }
 0x6ca   :  { %v2719_v10 = vld.sshfl [vmem:[#allocation1 + $0x8] sm:$0xff pattern:$0x75316420]  ;;  %v2718_v42 = vld.sshfl [vmem:[#allocation1] sm:$0xff pattern:$0x75316420]  ;;  %2725 = vrot.lane.b32.xlu0 %v2720_v15, %s3142_s18 }
 0x6cb   :  { %2721 = vrot.lane.b32.xlu2 %v2718_v42, %s3142_s18 }
 0x6cc   :  { %2723 = vrot.lane.b32.xlu1 %v2719_v10, %s3142_s18 }
 0x6d2   :  { %2651 = vrot.lane.b32.xlu0 %v2647_v40, %s3141_s17 }
 0x6d3   :  { %2653 = vrot.lane.b32.xlu2 %v2648_v3, %s3141_s17 }
 0x6d4   :  { %2639 = vrot.lane.b32.xlu1 %v2637_v36, %s3135_s11 }
 0x6f5   :  { %v2296_v53 = vpop.permute.xlu2 %2295 }
 0x6fc   :  { %1451 = vadd.xlane.f32.xlu0 %v1450_v50  ;;  %v2178_v54 = vpop.permute.xlu0 %2177 }
 0x6fd   :  { %v2366_v22 = vpop.permute.xlu2 %2365 }
 0x704   :  { %v2174_v57 = vpop.permute.xlu0 %2173 }
 0x705   :  { %v2438_v11 = vpop.permute.xlu2 %2437 }
 0x70c   :  { %v2176_v62 = vpop.permute.xlu0 %2175 }
 0x70d   :  { %v2294_v61 = vpop.permute.xlu1 %2293  ;;  %v2179_v63 = vsel %vm140_vm1, %v2174_v57, %v2176_v62  ;;  %v2180_v0 = vsel %vm140_vm1, %v2176_v62, %v2178_v54 }
 0x70e   :  { %v2299_v1 = vsel %vm273_vm2, %v2294_v61, %v2296_v53  ;;  %2942 = vmatpush.msk.msrb.mxu2 %vm117_vm4, %v2179_v63  ;;  %2944 = vmatpush.msk.msrb.mxu3 %vm117_vm4, %v2180_v0  ;;  %v2584_v9 = vpop.permute.xlu2 %2583 }
 0x70f   :  { %2943 = vmatmul.msk.f32.vlgmr.msrb.gmra.mxu2 %vm143_vm0, %v2164_v18  ;;  %2945 = vmatmul.msk.f32.vlgmr.msrb.gmra.mxu3 %vm143_vm0, %v2164_v18 }
 0x710   :  { %2950 = vmatpush.msk.msra.mxu2 %vm117_vm4, %v2299_v1 }
 0x711   :  { %v2274_v18 = vpop.f32.mrf.mxu1 }
 0x714   :  { %v2298_v5 = vpop.permute.xlu0 %2297 }
 0x715   :  { %v2300_v12 = vsel %vm273_vm2, %v2296_v53, %v2298_v5 }
 0x716   :  { %v2440_v8 = vpop.permute.xlu1 %2439  ;;  %2952 = vmatpush.msk.msra.mxu3 %vm117_vm4, %v2300_v12  ;;  %v2510_v29 = vpop.permute.xlu2 %2509 }
 0x717   :  { %v2442_v23 = vsel %vm424_vm6, %v2438_v11, %v2440_v8  ;;  %2951 = vmatmul.msk.f32.vlgmr.msra.gmra.mxu2 %vm143_vm0, %v2284_v4  ;;  %2953 = vmatmul.msk.f32.vlgmr.msra.gmra.mxu3 %vm143_vm0, %v2284_v4 }
 0x718   :  { %2960 = vmatpush.msk.msrb.mxu3 %vm117_vm4, %v2442_v23 }
 0x71c   :  { %v2370_v14 = vpop.permute.xlu0 %2369 }
 0x71e   :  { %v2368_v16 = vpop.permute.xlu1 %2367 }
 0x71f   :  { %v2371_v32 = vsel %vm353_vm3, %v2366_v22, %v2368_v16  ;;  %v2372_v13 = vsel %vm353_vm3, %v2368_v16, %v2370_v14  ;;  %2961 = vmatmul.msk.f32.vlgmr.msrb.gmra.mxu3 %vm143_vm0, %v2426_v46 }
 0x720   :  { %2954 = vmatpush.msk.msrb.mxu0 %vm117_vm4, %v2371_v32  ;;  %2956 = vmatpush.msk.msrb.mxu1 %vm117_vm4, %v2372_v13 }
 0x721   :  { %2955 = vmatmul.msk.f32.vlgmr.msrb.gmra.mxu0 %vm143_vm0, %v2356_v44  ;;  %2957 = vmatmul.msk.f32.vlgmr.msrb.gmra.mxu1 %vm143_vm0, %v2356_v44  ;;  %v2254_v44 = vpop.f32.mrf.mxu0 }
 0x724   :  { %v2436_v38 = vpop.permute.xlu0 %2435 }
 0x725   :  { %v2441_v51 = vsel %vm424_vm6, %v2436_v38, %v2438_v11  ;;  %v2722_v25 = vpop.permute.xlu2 %2721 }
 0x726   :  { %v2512_v17 = vpop.permute.xlu1 %2511  ;;  %2958 = vmatpush.msk.msrb.mxu2 %vm117_vm4, %v2441_v51 }
 0x727   :  { %v2514_v37 = vsel %vm504_vm8, %v2510_v29, %v2512_v17  ;;  %2959 = vmatmul.msk.f32.vlgmr.msrb.gmra.mxu2 %vm143_vm0, %v2426_v46 }
 0x728   :  { %2964 = vmatpush.msk.msra.mxu1 %vm117_vm4, %v2514_v37 }
 0x729   :  { %2965 = vmatmul.msk.f32.vlgmr.msra.gmra.mxu1 %vm143_vm0, %v2498_v49 }
 0x72c   :  { %v2508_v26 = vpop.permute.xlu0 %2507 }
 0x72d   :  { %v2513_v20 = vsel %vm504_vm8, %v2508_v26, %v2510_v29  ;;  %v2654_v47 = vpop.permute.xlu2 %2653 }
 0x72e   :  { %v2580_v19 = vpop.permute.xlu1 %2579  ;;  %2962 = vmatpush.msk.msra.mxu0 %vm117_vm4, %v2513_v20 }
 0x72f   :  { %2963 = vmatmul.msk.f32.vlgmr.msra.gmra.mxu0 %vm143_vm0, %v2498_v49 }
 0x734   :  { %v2582_v21 = vpop.permute.xlu0 %2581 }
 0x735   :  { %v2585_v24 = vsel %vm584_vm7, %v2580_v19, %v2582_v21  ;;  %v2586_v27 = vsel %vm584_vm7, %v2582_v21, %v2584_v9 }
 0x736   :  { %v2650_v45 = vpop.permute.xlu1 %2649  ;;  %2966 = vmatpush.msk.msra.mxu2 %vm117_vm4, %v2585_v24  ;;  %2968 = vmatpush.msk.msra.mxu3 %vm117_vm4, %v2586_v27 }
 0x737   :  { %2967 = vmatmul.msk.f32.vlgmr.msra.gmra.mxu2 %vm143_vm0, %v2570_v55  ;;  %2969 = vmatmul.msk.f32.vlgmr.msra.gmra.mxu3 %vm143_vm0, %v2570_v55 }
 0x73c   :  { %v2726_v6 = vpop.permute.xlu0 %2725 }
 0x73e   :  { %v2724_v7 = vpop.permute.xlu1 %2723 }
 0x73f   :  { %v2727_v52 = vsel %vm735_vm12, %v2722_v25, %v2724_v7  ;;  %v2728_v56 = vsel %vm735_vm12, %v2724_v7, %v2726_v6 }
 0x740   :  { %2974 = vmatpush.msk.msrb.mxu2 %vm117_vm4, %v2727_v52  ;;  %2976 = vmatpush.msk.msrb.mxu3 %vm117_vm4, %v2728_v56 }
 0x741   :  { %2975 = vmatmul.msk.f32.vlgmr.msrb.gmra.mxu2 %vm143_vm0, %v3699_v48  ;;  %2977 = vmatmul.msk.f32.vlgmr.msrb.gmra.mxu3 %vm143_vm0, %v3699_v48 }
 0x744   :  { %v2652_v28 = vpop.permute.xlu0 %2651 }
 0x745   :  { %v2655_v60 = vsel %vm655_vm11, %v2650_v45, %v2652_v28  ;;  %v2656_v59 = vsel %vm655_vm11, %v2652_v28, %v2654_v47  ;;  %v3013_v28 = vld [vmem:[#allocation3] sm:$0xff] }
 0x746   :  { %v2640_v30 = vpop.permute.xlu1 %2639  ;;  %2970 = vmatpush.msk.msrb.mxu0 %vm117_vm4, %v2655_v60  ;;  %2972 = vmatpush.msk.msrb.mxu1 %vm117_vm4, %v2656_v59 }
 0x747   :  { %2971 = vmatmul.msk.f32.vlgmr.msrb.gmra.mxu0 %vm143_vm0, %v2640_v30  ;;  %2973 = vmatmul.msk.f32.vlgmr.msrb.gmra.mxu1 %vm143_vm0, %v2640_v30 }
 0x76f   :  { %v1452_v31 = vpop.xlane.xlu0 %1451 }
 0x770   :  { %v1453_v34 = vmul.f32 0.00390625, %v1452_v31 }
 0x772   :  { %v1454_v35 = vsub.f32 %v3627_v43, %v1453_v34  ;;  %v1455_v3 = vsub.f32 %v3629_v33, %v1453_v34 }
 0x774   :  { %v1456_v39 = vmul.f32 %v1454_v35, %v1454_v35  ;;  %v1457_v40 = vmul.f32 %v1455_v3, %v1455_v3 }
 0x776   :  { %v1458_v41 = vsel %vm117_vm4, %v1456_v39, 0.0  ;;  %v1459_v10 = vsel %vm117_vm4, %v1457_v40, 0.0 }
 0x777   :  { %v1460_v42 = vadd.f32 %v1459_v10, %v1458_v41 }
 0x779   :  { %1461 = vadd.xlane.f32.xlu1 %v1460_v42 }
 0x792   :  { %v2224_v15 = vpop.f32.mrf.mxu3  ;;  %v2204_v36 = vpop.f32.mrf.mxu2 }
 0x793   :  { %v2255_v2 = vadd.f32 %v2254_v44, %v2204_v36  ;;  %v2275_v33 = vadd.f32 %v2274_v18, %v2224_v15 }
 0x79a   :  { %v2344_v4 = vpop.f32.mrf.mxu3  ;;  %v2324_v46 = vpop.f32.mrf.mxu2 }
 0x79b   :  { %v2347_v50 = vadd.f32 %v2324_v46, %v2255_v2  ;;  %v2348_v53 = vadd.f32 %v2344_v4, %v2275_v33 }
 0x79e   :  { %v2416_v48 = vpop.f32.mrf.mxu1  ;;  %v2396_v49 = vpop.f32.mrf.mxu0 }
 0x79f   :  { %v2419_v54 = vadd.f32 %v2396_v49, %v2347_v50  ;;  %v2420_v55 = vadd.f32 %v2416_v48, %v2348_v53  ;;  %v3014_v50 = vld [vmem:[#allocation3 + $0x8] sm:$0xff] }
 0x7a2   :  { %v2486_v58 = vpop.f32.mrf.mxu3 }
 0x7a3   :  { %v2490_v63 = vadd.f32 %v2486_v58, %v2420_v55 }
 0x7a6   :  { %v2558_v57 = vpop.f32.mrf.mxu1 }
 0x7a7   :  { %v2562_v1 = vadd.f32 %v2558_v57, %v2490_v63 }
 0x7aa   :  { %v2466_v43 = vpop.f32.mrf.mxu2 }
 0x7ab   :  { %v2489_v0 = vadd.f32 %v2466_v43, %v2419_v54 }
 0x7ac   :  { %v2538_v22 = vpop.f32.mrf.mxu0 }
 0x7ad   :  { %v2561_v11 = vadd.f32 %v2538_v22, %v2489_v0 }
 0x7ba   :  { %v2610_v61 = vpop.f32.mrf.mxu2  ;;  %v2630_v62 = vpop.f32.mrf.mxu3 }
 0x7bb   :  { %v2633_v5 = vadd.f32 %v2610_v61, %v2561_v11  ;;  %v2634_v8 = vadd.f32 %v2630_v62, %v2562_v1 }
 0x7c4   :  { %v2680_v12 = vpop.f32.mrf.mxu0  ;;  %v2700_v23 = vpop.f32.mrf.mxu1 }
 0x7c5   :  { %v2703_v9 = vadd.f32 %v2680_v12, %v2633_v5  ;;  %v2704_v14 = vadd.f32 %v2700_v23, %v2634_v8  ;;  %v2752_v16 = vpop.f32.mrf.mxu2  ;;  %v2772_v32 = vpop.f32.mrf.mxu3 }
 0x7c7   :  { %v2775_v13 = vadd.f32 %v2752_v16, %v2703_v9  ;;  %v2776_v29 = vadd.f32 %v2772_v32, %v2704_v14 }
 0x7c9   :  { %v2777_v38 = vsel %vm117_vm4, %v2775_v13, 0.0  ;;  %v2778_v17 = vsel %vm117_vm4, %v2776_v29, 0.0 }
 0x7ca   :  { %v2779_v51 = vadd.f32 %v2778_v17, %v2777_v38 }
 0x7cc   :  { %2780 = vadd.xlane.f32.xlu2 %v2779_v51 }
 0x7ec   :  { %v1462_v37 = vpop.xlane.xlu1 %1461 }
 0x7ed   :  { %v1463_v26 = vmul.f32 0.00390625, %v1462_v37 }
 0x7ef   :  { %v1464_v19 = vadd.f32 1e-05, %v1463_v26 }
 0x7f1   :  { %3009 = vrsqrt.f32 %v1464_v19  ;;  %vm1471_vm9 = vweird.f32 %v1464_v19 }
 0x7f7   :  { %v3010_v20 = vpop.eup %3009 }
 0x7f8   :  { %v1466_v21 = vmul.f32 %v3010_v20, %v1464_v19  ;;  %vm1472_vm5 = vweird.f32 %v3010_v20 }
 0x7f9   :  { %vm1473_vm10 = vmor %vm1471_vm9, %vm1472_vm5 }
 0x7fa   :  { %v1467_v45 = vmul.f32 %v3010_v20, %v1466_v21 }
 0x7fc   :  { %v1468_v24 = vmul.f32 0.5, %v1467_v45 }
 0x7fe   :  { %v1469_v27 = vsub.f32 1.5, %v1468_v24 }
 0x800   :  { %v1470_v25 = vmul.f32 %v3010_v20, %v1469_v27 }
 0x802   :  { %v1474_v6 = vsel %vm1473_vm10, %v3010_v20, %v1470_v25 }
 0x803   :  { %v1476_v7 = vmul.f32 %v1474_v6, %v1455_v3  ;;  %v1475_v52 = vmul.f32 %v1474_v6, %v1454_v35 }
 0x805   :  { %v1479_v56 = vrot.slane %v1476_v7, 4 }
 0x807   :  { %v1480_v47 = vsel %vm117_vm4, %v1475_v52, %v1479_v56 }
 0x808   :  { %v1482_v30 = vadd.f32 %v3013_v28, %v1480_v47 }
 0x80a   :  { %1483 = vst [vmem:[#allocation9] sm:$0xff] %v1482_v30 }
 0x83f   :  { %v2781_v60 = vpop.xlane.xlu2 %2780 }
 0x840   :  { %v2782_v59 = vmul.f32 0.00390625, %v2781_v60 }
 0x842   :  { %v2783_v31 = vsub.f32 %v2775_v13, %v2782_v59  ;;  %v2784_v34 = vsub.f32 %v2776_v29, %v2782_v59 }
 0x844   :  { %v2785_v39 = vmul.f32 %v2783_v31, %v2783_v31  ;;  %v2786_v40 = vmul.f32 %v2784_v34, %v2784_v34 }
 0x846   :  { %v2787_v41 = vsel %vm117_vm4, %v2785_v39, 0.0  ;;  %v2788_v10 = vsel %vm117_vm4, %v2786_v40, 0.0 }
 0x847   :  { %v2789_v42 = vadd.f32 %v2788_v10, %v2787_v41 }
 0x849   :  { %2790 = vadd.xlane.f32.xlu0 %v2789_v42 }
 0x8bc   :  { %v2791_v3 = vpop.xlane.xlu0 %2790 }
 0x8bd   :  { %v2792_v35 = vmul.f32 0.00390625, %v2791_v3 }
 0x8bf   :  { %v2793_v15 = vadd.f32 1e-05, %v2792_v35 }
 0x8c1   :  { %3011 = vrsqrt.f32 %v2793_v15  ;;  %vm2800_vm1 = vweird.f32 %v2793_v15 }
 0x8c7   :  { %v3012_v36 = vpop.eup %3011 }
 0x8c8   :  { %v2795_v18 = vmul.f32 %v3012_v36, %v2793_v15  ;;  %vm2801_vm0 = vweird.f32 %v3012_v36 }
 0x8c9   :  { %vm2802_vm2 = vmor %vm2800_vm1, %vm2801_vm0 }
 0x8ca   :  { %v2796_v4 = vmul.f32 %v3012_v36, %v2795_v18 }
 0x8cc   :  { %v2797_v44 = vmul.f32 0.5, %v2796_v4 }
 0x8ce   :  { %v2798_v46 = vsub.f32 1.5, %v2797_v44 }
 0x8d0   :  { %v2799_v48 = vmul.f32 %v3012_v36, %v2798_v46 }
 0x8d2   :  { %v2803_v49 = vsel %vm2802_vm2, %v3012_v36, %v2799_v48 }
 0x8d3   :  { %v2805_v58 = vmul.f32 %v2803_v49, %v2784_v34  ;;  %v2804_v43 = vmul.f32 %v2803_v49, %v2783_v31 }
 0x8d5   :  { %v2808_v2 = vrot.slane %v2805_v58, 4 }
 0x8d7   :  { %v2809_v33 = vsel %vm117_vm4, %v2804_v43, %v2808_v2 }
 0x8d8   :  { %v2811_v53 = vadd.f32 %v3014_v50, %v2809_v33 }
 0x8da   :  { %2813 = vst [vmem:[#allocation9 + $0x8] sm:$0xff] %v2811_v53 }
 0x8db   :  { %2826 = dma.vmem_to_hbm [thread:$0]  %s2819_s20, 256, %s2821_s24, [#allocation5], %s3119_s22, %s3119_s22, %s3120_s23  }
 0x8dc   :  { %3115 = dma.done.wait [#allocation5], 256  }
 0x8dd   :  { %3116 = vsyncadd [#allocation5], 4294967040 }
 0x8de   :  { %2831 = vsyncpa [#allocation4], 1 }
 0x8df   :  { %2832 = vsyncpa [#allocation7], 1 }
 0x8e0   :  { %2833 = vsyncpa [#allocation5], 1 }

</bundles_post_ra>
